<compile_context>
chip_gen: v5e
topology: v5e:2x2
jax: 0.10.0
libtpu: 0.0.40
codegen_flags: <defaults>
</compile_context>

<pallas_src>
import jax
import jax.numpy as jnp
from jax.experimental import pallas as pl
from jax.experimental.pallas import tpu as pltpu

EMBED = 256          # fixed by nn.Linear(256, ...)
NUM_CLUSTERS = 4     # must equal batch size (required by the module's broadcast)
HIDDEN = 32


def _sae_kernel(x_ref, we_ref, be_ref, wc_ref, bc_ref, eps_ref, mix_ref, kl_ref):
    """Single invocation: pool -> experts -> gating -> reparam -> mix -> KL.

    x_ref:   (N, E, HW)   x in its native (N, C, H*W) layout
    we_ref:  (E, 2*C*H)   fused expert weights [W_mu | W_logvar]  (exactly 256 cols)
    be_ref:  (1, 2*C*H)   fused expert bias
    wc_ref:  (E, C)       gating weights
    bc_ref:  (1, C)       gating bias
    eps_ref: (N, C*H)     reparam noise; eps_ref[n, c*H + h] == eps3[c, n, h]
    mix_ref: (N, C*H)     output: full lane-dense mix (w @ z); block-diagonal == z
    kl_ref:  (1, 1)       output: KL scalar
    """
    hw = x_ref.shape[-1]

    # spatial mean pool: cross-lane (XLU) reduce over the token axis -> (N, E)
    pooled = jnp.sum(x_ref[...], axis=-1) * (1.0 / hw)

    ch = eps_ref.shape[-1]                                   # C * H (== 128 here)

    # all C expert Linears as one 256-wide MXU matmul: (N, E) @ (E, 2*C*H)
    y = jnp.dot(pooled, we_ref[...], preferred_element_type=jnp.float32) + be_ref[...]
    mu = y[:, :ch]                                           # (N, C*H)
    logvar = y[:, ch:]                                       # (N, C*H)

    std = jnp.exp(0.5 * logvar)
    z = mu + eps_ref[...] * std                              # z[n, c*H+h] == z3[c, n, h]

    # KL (std*std == exp(logvar): saves one EUP pass)
    kl_ref[...] = -0.5 * jnp.sum(1.0 + logvar - mu * mu - std * std, keepdims=True)

    # gating logits: separate tiny matmul keeps the big matmul exactly one MXU tile wide
    logits = jnp.dot(pooled, wc_ref[...], preferred_element_type=jnp.float32) + bc_ref[...]
    m = jnp.max(logits, axis=1, keepdims=True)
    e = jnp.exp(logits - m)
    w = e * pl.reciprocal(jnp.sum(e, axis=1, keepdims=True), approx=True)   # (N, C)

    # cluster-weighted mix:  out[a, h] = sum_b w[a, b] * z3[a, b, h] = (w @ z)[a, a*H + h]
    # Store the full lane-dense (N, C*H) product; wrapper slices the block diagonal.
    mix_ref[...] = jnp.dot(w, z, preferred_element_type=jnp.float32)


def _prep_fused_weights(params, c, hdim):
    """Fuse all C expert Linears into one (E, 2*C*H) weight + (1, 2*C*H) bias."""
    we = params["expert_w"]                           # (C, 2H, E)  torch layout (out, in)
    be = params["expert_b"]                           # (C, 2H)
    w_mu = jnp.transpose(we[:, :hdim, :], (2, 0, 1)).reshape(EMBED, c * hdim)
    w_lv = jnp.transpose(we[:, hdim:, :], (2, 0, 1)).reshape(EMBED, c * hdim)
    b_mu = be[:, :hdim].reshape(c * hdim)
    b_lv = be[:, hdim:].reshape(c * hdim)
    wf = jnp.concatenate([w_mu, w_lv], axis=1)                # (E, 2*C*H)
    bf = jnp.concatenate([b_mu, b_lv]).reshape(1, -1)         # (1, 2*C*H)
    return wf, bf


@jax.jit
def scenario_adaptive_forward(x, eps, params):
    n, e_in, hs, ws = x.shape
    assert e_in == EMBED
    c, n2, hdim = eps.shape                          # eps: (C, N, H)
    assert n2 == n
    assert n == c, "module's broadcast requires batch == num_clusters"
    hw = hs * ws

    # native layout: (N, E, H, W) -> (N, E, HW) is a contiguous collapse (no HBM traffic)
    x_tok = x.reshape(n, EMBED, hw)
    # eps (C, N, H) -> (N, C*H): tiny (16 KiB) transpose in XLA
    eps_flat = jnp.transpose(eps, (1, 0, 2)).reshape(n, c * hdim)
    we, be = _prep_fused_weights(params, c, hdim)
    wc = params["cluster_w"].T                        # (E, C)
    bc = params["cluster_b"].reshape(1, c)

    # TODO(synk): for large H*W, split into (1) a pooling pallas_call with
    # grid=(N, HW//T_tok), dimension_semantics=("parallel","arbitrary") producing
    # pooled (N, E) in ~2K-token tiles (stays within scoped VMEM, uses both v7x TCs),
    # and (2) this tiny head.  At the current shapes one step is strictly faster.
    mix, kl = pl.pallas_call(
        _sae_kernel,
        grid=(1,),
        in_specs=[
            pl.BlockSpec((n, EMBED, hw), lambda i: (0, 0, 0)),      # x, native layout
            pl.BlockSpec((EMBED, 2 * c * hdim), lambda i: (0, 0)),  # fused expert W
            pl.BlockSpec((1, 2 * c * hdim), lambda i: (0, 0)),      # fused expert b
            pl.BlockSpec((EMBED, c), lambda i: (0, 0)),             # gating W
            pl.BlockSpec((1, c), lambda i: (0, 0)),                 # gating b
            pl.BlockSpec((n, c * hdim), lambda i: (0, 0)),          # eps
        ],
        out_specs=(
            pl.BlockSpec((n, c * hdim), lambda i: (0, 0)),          # lane-dense mix
            pl.BlockSpec((1, 1), lambda i: (0, 0)),
        ),
        out_shape=(
            jax.ShapeDtypeStruct((n, c * hdim), jnp.float32),
            jax.ShapeDtypeStruct((1, 1), jnp.float32),
        ),
        compiler_params=pltpu.CompilerParams(
            dimension_semantics=("arbitrary",),
        ),
    )(x_tok, we, be, wc, bc, eps_flat)

    # block-diagonal extraction: z[i, :] = mix[i, i*H:(i+1)*H]  (tiny, done in XLA)
    z = mix.reshape(n, c, hdim)[jnp.arange(c), jnp.arange(c), :]
    return z, kl[0, 0]


def init_params(key, c, hdim):
    """Deterministic synthetic params matching Linear(256, C) + C x Linear(256, 2H)."""
    k1, k2, k3, k4 = jax.random.split(key, 4)
    s = 1.0 / (EMBED ** 0.5)
    return dict(
        cluster_w=jax.random.normal(k1, (c, EMBED), jnp.float32) * s,
        cluster_b=jax.random.normal(k2, (c,), jnp.float32) * 0.02,
        expert_w=jax.random.normal(k3, (c, 2 * hdim, EMBED), jnp.float32) * s,
        expert_b=jax.random.normal(k4, (c, 2 * hdim), jnp.float32) * 0.02,
    )


def reference_forward(x, eps, params):
    """Pure-JAX reference mirroring the PyTorch module (same eps)."""
    pooled = x.mean(axis=(2, 3))                                            # (N, E)
    w = jax.nn.softmax(pooled @ params["cluster_w"].T + params["cluster_b"], axis=1)
    zp = jnp.einsum("ne,coe->cno", pooled, params["expert_w"]) \
        + params["expert_b"][:, None, :]                                    # (C, N, 2H)
    hdim = eps.shape[-1]
    mu, logvar = zp[..., :hdim], zp[..., hdim:]
    std = jnp.exp(0.5 * logvar)
    z3 = mu + eps * std                                                     # (C, N, H)
    zmix = (w[:, :, None] * z3).sum(axis=1)                                 # needs N == C
    kl = -0.5 * jnp.sum(1.0 + logvar - mu ** 2 - jnp.exp(logvar))
    return zmix, kl


if __name__ == "__main__":
    key = jax.random.PRNGKey(0)
    kx, ke, kp = jax.random.split(key, 3)

    n = NUM_CLUSTERS                     # batch == num_clusters (module's broadcast)
    x = jax.random.normal(kx, (n, EMBED, 8, 8), jnp.float32)
    # torch.randn_like(std): noise sampled host-side so kernel and reference agree.
    eps = jax.random.normal(ke, (NUM_CLUSTERS, n, HIDDEN), jnp.float32)
    params = init_params(kp, NUM_CLUSTERS, HIDDEN)

    z, kl = scenario_adaptive_forward(x, eps, params)
    jax.block_until_ready((z, kl))

    z_ref, kl_ref = reference_forward(x, eps, params)
    assert z.shape == (NUM_CLUSTERS, HIDDEN)
    # slightly relaxed atol on z: softmax denom uses the EUP approximate reciprocal
    assert jnp.allclose(z, z_ref, atol=2e-3, rtol=1e-3), (z, z_ref)
    assert jnp.allclose(kl, kl_ref, atol=1e-3, rtol=1e-3), (kl, kl_ref)
    print("KERNEL_OK")
</pallas_src>

<mosaic_0001>
module attributes {stable_mosaic.version = 11 : i64} {
  func.func @_sae_kernel(%arg0: i32, %arg1: memref<4x256x64xf32, #tpu.memory_space<vmem>>, %arg2: memref<256x256xf32, #tpu.memory_space<vmem>>, %arg3: memref<1x256xf32, #tpu.memory_space<vmem>>, %arg4: memref<256x4xf32, #tpu.memory_space<vmem>>, %arg5: memref<1x4xf32, #tpu.memory_space<vmem>>, %arg6: memref<4x128xf32, #tpu.memory_space<vmem>>, %arg7: memref<4x128xf32, #tpu.memory_space<vmem>>, %arg8: memref<1x1xf32, #tpu.memory_space<vmem>>) attributes {dimension_semantics = [#tpu.dimension_semantics<arbitrary>], iteration_bounds = array<i64: 1>, scalar_prefetch = 0 : i64, scratch_operands = 0 : i64, tpu.core_type = #tpu.core_type<tc>, window_params = [{pipeline_mode = #tpu.pipeline_mode<synchronous>, transform_indices = @transform_0, window_bounds = array<i64: 4, 256, 64>}, {pipeline_mode = #tpu.pipeline_mode<synchronous>, transform_indices = @transform_1, window_bounds = array<i64: 256, 256>}, {pipeline_mode = #tpu.pipeline_mode<synchronous>, transform_indices = @transform_2, window_bounds = array<i64: 1, 256>}, {pipeline_mode = #tpu.pipeline_mode<synchronous>, transform_indices = @transform_3, window_bounds = array<i64: 256, 4>}, {pipeline_mode = #tpu.pipeline_mode<synchronous>, transform_indices = @transform_4, window_bounds = array<i64: 1, 4>}, {pipeline_mode = #tpu.pipeline_mode<synchronous>, transform_indices = @transform_5, window_bounds = array<i64: 4, 128>}, {pipeline_mode = #tpu.pipeline_mode<synchronous>, transform_indices = @transform_6, window_bounds = array<i64: 4, 128>}, {pipeline_mode = #tpu.pipeline_mode<synchronous>, transform_indices = @transform_7, window_bounds = array<i64: 1, 1>}]} {
    %c0 = arith.constant 0 : index
    %c0_0 = arith.constant 0 : index
    %c0_1 = arith.constant 0 : index
    %0 = vector.load %arg1[%c0, %c0_0, %c0_1] : memref<4x256x64xf32, #tpu.memory_space<vmem>>, vector<4x256x64xf32>
    %cst = arith.constant dense<0.000000e+00> : vector<4x256xf32>
    %1 = vector.multi_reduction <add>, %0, %cst [2] : vector<4x256x64xf32> to vector<4x256xf32>
    %cst_2 = arith.constant 1.562500e-02 : f32
    %2 = vector.broadcast %cst_2 : f32 to vector<4x256xf32>
    %3 = arith.mulf %1, %2 : vector<4x256xf32>
    %c0_3 = arith.constant 0 : index
    %c0_4 = arith.constant 0 : index
    %4 = vector.load %arg2[%c0_3, %c0_4] : memref<256x256xf32, #tpu.memory_space<vmem>>, vector<256x256xf32>
    %cst_5 = arith.constant dense<0.000000e+00> : vector<4x256xf32>
    %5 = tpu.matmul %3, %4, %cst_5 {dimension_numbers = #tpu.dot_dimension_numbers<[1], [0], [0], [1], [0, 0, 1, 1], [], []>} : vector<4x256xf32>, vector<256x256xf32>, vector<4x256xf32> -> vector<4x256xf32>
    %c0_6 = arith.constant 0 : index
    %c0_7 = arith.constant 0 : index
    %6 = vector.load %arg3[%c0_6, %c0_7] : memref<1x256xf32, #tpu.memory_space<vmem>>, vector<1x256xf32>
    %7 = vector.broadcast %6 : vector<1x256xf32> to vector<4x256xf32>
    %8 = arith.addf %5, %7 : vector<4x256xf32>
    %9 = vector.extract_strided_slice %8 {offsets = [0, 0], sizes = [4, 128], strides = [1, 1]} : vector<4x256xf32> to vector<4x128xf32>
    %10 = vector.extract_strided_slice %8 {offsets = [0, 128], sizes = [4, 128], strides = [1, 1]} : vector<4x256xf32> to vector<4x128xf32>
    %cst_8 = arith.constant 5.000000e-01 : f32
    %11 = vector.broadcast %cst_8 : f32 to vector<4x128xf32>
    %12 = arith.mulf %11, %10 : vector<4x128xf32>
    %13 = math.exp %12 : vector<4x128xf32>
    %c0_9 = arith.constant 0 : index
    %c0_10 = arith.constant 0 : index
    %14 = vector.load %arg6[%c0_9, %c0_10] : memref<4x128xf32, #tpu.memory_space<vmem>>, vector<4x128xf32>
    %15 = arith.mulf %14, %13 : vector<4x128xf32>
    %16 = arith.addf %9, %15 : vector<4x128xf32>
    %cst_11 = arith.constant 1.000000e+00 : f32
    %17 = vector.broadcast %cst_11 : f32 to vector<4x128xf32>
    %18 = arith.addf %17, %10 : vector<4x128xf32>
    %19 = arith.mulf %9, %9 : vector<4x128xf32>
    %20 = arith.subf %18, %19 : vector<4x128xf32>
    %21 = arith.mulf %13, %13 : vector<4x128xf32>
    %22 = arith.subf %20, %21 : vector<4x128xf32>
    %23 = vector.shape_cast %22 : vector<4x128xf32> to vector<1x4x128xf32>
    %cst_12 = arith.constant dense<0.000000e+00> : vector<1xf32>
    %24 = vector.multi_reduction <add>, %23, %cst_12 [1, 2] : vector<1x4x128xf32> to vector<1xf32>
    %25 = vector.shape_cast %24 : vector<1xf32> to vector<1x1x1xf32>
    %26 = vector.extract %25[0, 0, 0] : f32 from vector<1x1x1xf32>
    %27 = vector.broadcast %26 : f32 to vector<1x1xf32>
    %cst_13 = arith.constant -5.000000e-01 : f32
    %28 = vector.broadcast %cst_13 : f32 to vector<1x1xf32>
    %29 = arith.mulf %28, %27 : vector<1x1xf32>
    %c0_14 = arith.constant 0 : index
    %c0_15 = arith.constant 0 : index
    %30 = vector.load %arg8[%c0_14, %c0_15] : memref<1x1xf32, #tpu.memory_space<vmem>>, vector<1x1xf32>
    tpu.vector_store %arg8[%c0_14, %c0_15], %29 {strides = array<i32>} : memref<1x1xf32, #tpu.memory_space<vmem>>, vector<1x1xf32>,
    %c0_16 = arith.constant 0 : index
    %c0_17 = arith.constant 0 : index
    %31 = vector.load %arg4[%c0_16, %c0_17] : memref<256x4xf32, #tpu.memory_space<vmem>>, vector<256x4xf32>
    %cst_18 = arith.constant dense<0.000000e+00> : vector<4x4xf32>
    %32 = tpu.matmul %3, %31, %cst_18 {dimension_numbers = #tpu.dot_dimension_numbers<[1], [0], [0], [1], [0, 0, 1, 1], [], []>} : vector<4x256xf32>, vector<256x4xf32>, vector<4x4xf32> -> vector<4x4xf32>
    %c0_19 = arith.constant 0 : index
    %c0_20 = arith.constant 0 : index
    %33 = vector.load %arg5[%c0_19, %c0_20] : memref<1x4xf32, #tpu.memory_space<vmem>>, vector<1x4xf32>
    %34 = vector.broadcast %33 : vector<1x4xf32> to vector<4x4xf32>
    %35 = arith.addf %32, %34 : vector<4x4xf32>
    %cst_21 = arith.constant dense<0xFF800000> : vector<4xf32>
    %36 = vector.multi_reduction <maximumf>, %35, %cst_21 [1] : vector<4x4xf32> to vector<4xf32>
    %37 = vector.shape_cast %36 : vector<4xf32> to vector<4x1xf32>
    %38 = vector.broadcast %37 : vector<4x1xf32> to vector<4x4xf32>
    %39 = arith.subf %35, %38 : vector<4x4xf32>
    %40 = math.exp %39 : vector<4x4xf32>
    %cst_22 = arith.constant dense<0.000000e+00> : vector<4xf32>
    %41 = vector.multi_reduction <add>, %40, %cst_22 [1] : vector<4x4xf32> to vector<4xf32>
    %42 = vector.shape_cast %41 : vector<4xf32> to vector<4x1xf32>
    %43 = tpu.reciprocal %42 {approx = true} : vector<4x1xf32> -> vector<4x1xf32>
    %44 = vector.broadcast %43 : vector<4x1xf32> to vector<4x4xf32>
    %45 = arith.mulf %40, %44 : vector<4x4xf32>
    %cst_23 = arith.constant dense<0.000000e+00> : vector<4x128xf32>
    %46 = tpu.matmul %45, %16, %cst_23 {dimension_numbers = #tpu.dot_dimension_numbers<[1], [0], [0], [1], [0, 0, 1, 1], [], []>} : vector<4x4xf32>, vector<4x128xf32>, vector<4x128xf32> -> vector<4x128xf32>
    %c0_24 = arith.constant 0 : index
    %c0_25 = arith.constant 0 : index
    %47 = vector.load %arg7[%c0_24, %c0_25] : memref<4x128xf32, #tpu.memory_space<vmem>>, vector<4x128xf32>
    tpu.vector_store %arg7[%c0_24, %c0_25], %46 {strides = array<i32>} : memref<4x128xf32, #tpu.memory_space<vmem>>, vector<4x128xf32>,
    return
  }
  func.func @transform_0(%arg0: i32) -> (i32, i32, i32) {
    %c0_i32 = arith.constant 0 : i32
    %c0_i32_0 = arith.constant 0 : i32
    %c0_i32_1 = arith.constant 0 : i32
    %c0_i32_2 = arith.constant 0 : i32
    return %c0_i32, %c0_i32_0, %c0_i32_1 : i32, i32, i32
  }
  func.func @transform_1(%arg0: i32) -> (i32, i32) {
    %c0_i32 = arith.constant 0 : i32
    %c0_i32_0 = arith.constant 0 : i32
    %c0_i32_1 = arith.constant 0 : i32
    return %c0_i32, %c0_i32_0 : i32, i32
  }
  func.func @transform_2(%arg0: i32) -> (i32, i32) {
    %c0_i32 = arith.constant 0 : i32
    %c0_i32_0 = arith.constant 0 : i32
    %c0_i32_1 = arith.constant 0 : i32
    return %c0_i32, %c0_i32_0 : i32, i32
  }
  func.func @transform_3(%arg0: i32) -> (i32, i32) {
    %c0_i32 = arith.constant 0 : i32
    %c0_i32_0 = arith.constant 0 : i32
    %c0_i32_1 = arith.constant 0 : i32
    return %c0_i32, %c0_i32_0 : i32, i32
  }
  func.func @transform_4(%arg0: i32) -> (i32, i32) {
    %c0_i32 = arith.constant 0 : i32
    %c0_i32_0 = arith.constant 0 : i32
    %c0_i32_1 = arith.constant 0 : i32
    return %c0_i32, %c0_i32_0 : i32, i32
  }
  func.func @transform_5(%arg0: i32) -> (i32, i32) {
    %c0_i32 = arith.constant 0 : i32
    %c0_i32_0 = arith.constant 0 : i32
    %c0_i32_1 = arith.constant 0 : i32
    return %c0_i32, %c0_i32_0 : i32, i32
  }
  func.func @transform_6(%arg0: i32) -> (i32, i32) {
    %c0_i32 = arith.constant 0 : i32
    %c0_i32_0 = arith.constant 0 : i32
    %c0_i32_1 = arith.constant 0 : i32
    return %c0_i32, %c0_i32_0 : i32, i32
  }
  func.func @transform_7(%arg0: i32) -> (i32, i32) {
    %c0_i32 = arith.constant 0 : i32
    %c0_i32_0 = arith.constant 0 : i32
    %c0_i32_1 = arith.constant 0 : i32
    return %c0_i32, %c0_i32_0 : i32, i32
  }
}

</mosaic_0001>

<bundles_post_ra>
// kernel: scenario_adaptive_forward.1
= control target key start
LH: loop header
LB: loop body
LE: loop exit
PB: predicated region body
PF: predicated region fallthrough
CT: control target
= control target key end

     0   :  { %vm154_vm0 = vcmask 523264   ;;  %s2802_s0 = inlined_call_operand.vmem [shape: f32[4,256,64], index: 0, kind: input, shape index: {}]   ;;  %s2803_s1 = inlined_call_operand.vmem [shape: f32[256,256], index: 1, kind: input, shape index: {}]   ;;  %s2804_s2 = inlined_call_operand.vmem [shape: f32[1,256], index: 2, kind: input, shape index: {}]   ;;  %s2805_s3 = inlined_call_operand.vmem [shape: f32[256,4], index: 3, kind: input, shape index: {}]   ;;  %s2806_s4 = inlined_call_operand.vmem [shape: f32[1,4], index: 4, kind: input, shape index: {}]   ;;  %s2807_s5 = inlined_call_operand.vmem [shape: f32[4,128], index: 5, kind: input, shape index: {}]   ;;  %s2808_s6 = inlined_call_operand.vmem [shape: f32[4,128], index: 6, kind: output, shape index: {0}]   ;;  %s2809_s7 = inlined_call_operand.hbm [shape: f32[1,1], index: 7, kind: output, shape index: {1}]  }
   0x1   :  { %v58_v0 = vld [vmem:[%s2802_s0 + $0x100] sm:$0xff]  ;;  %v28_v1 = vld [vmem:[%s2802_s0 + $0x10] sm:$0xff]  ;;  %v59_v6 = vld [vmem:[%s2802_s0 + $0x108] sm:$0xff] }
   0x2   :  { %v26_v2 = vld [vmem:[%s2802_s0] sm:$0xff]  ;;  %v251_v3 = vsel %vm154_vm0, %v58_v0, 0.0  ;;  %v161_v4 = vsel %vm154_vm0, %v28_v1, 0.0  ;;  %v60_v7 = vld [vmem:[%s2802_s0 + $0x110] sm:$0xff]  ;;  %v27_v8 = vld [vmem:[%s2802_s0 + $0x8] sm:$0xff] }
   0x3   :  { %v155_v5 = vsel %vm154_vm0, %v26_v2, 0.0  ;;  %252 = vadd.xlane.f32.xlu1 %v251_v3  ;;  %162 = vadd.xlane.f32.xlu2 %v161_v4 }
   0x4   :  { %156 = vadd.xlane.f32.xlu0 %v155_v5 }
   0x5   :  { %13 = vsyncpa [#allocation3], 0  ;;  %v254_v9 = vsel %vm154_vm0, %v59_v6, 0.0  ;;  %v257_v10 = vsel %vm154_vm0, %v60_v7, 0.0  ;;  %v158_v11 = vsel %vm154_vm0, %v27_v8, 0.0  ;;  %v91_v12 = vld [vmem:[%s2802_s0 + $0x208] sm:$0xff] }
   0x6   :  { %v29_v13 = vld [vmem:[%s2802_s0 + $0x18] sm:$0xff]  ;;  %v90_v14 = vld [vmem:[%s2802_s0 + $0x200] sm:$0xff]  ;;  %v350_v15 = vsel %vm154_vm0, %v91_v12, 0.0  ;;  %v43_v18 = vld [vmem:[%s2802_s0 + $0x88] sm:$0xff]  ;;  %vm870_vm1 = vcmask 130112   ;;  %vm874_vm2 = vcmask 195712  }
   0x7   :  { %v164_v16 = vsel %vm154_vm0, %v29_v13, 0.0  ;;  %v347_v17 = vsel %vm154_vm0, %v90_v14, 0.0  ;;  %v61_v19 = vld [vmem:[%s2802_s0 + $0x118] sm:$0xff]  ;;  %v42_v20 = vld [vmem:[%s2802_s0 + $0x80] sm:$0xff]  ;;  %v206_v21 = vsel %vm154_vm0, %v43_v18, 0.0  ;;  %v75_v24 = vld [vmem:[%s2802_s0 + $0x188] sm:$0xff] }
   0x8   :  { %v260_v22 = vsel %vm154_vm0, %v61_v19, 0.0  ;;  %v203_v23 = vsel %vm154_vm0, %v42_v20, 0.0  ;;  %v92_v25 = vld [vmem:[%s2802_s0 + $0x210] sm:$0xff]  ;;  %v74_v26 = vld [vmem:[%s2802_s0 + $0x180] sm:$0xff]  ;;  %v302_v27 = vsel %vm154_vm0, %v75_v24, 0.0  ;;  %v123_v30 = vld [vmem:[%s2802_s0 + $0x308] sm:$0xff] }
   0x9   :  { %v353_v28 = vsel %vm154_vm0, %v92_v25, 0.0  ;;  %v299_v29 = vsel %vm154_vm0, %v74_v26, 0.0  ;;  %v30_v31 = vld [vmem:[%s2802_s0 + $0x20] sm:$0xff]  ;;  %v446_v33 = vsel %vm154_vm0, %v123_v30, 0.0  ;;  %v76_v37 = vld [vmem:[%s2802_s0 + $0x190] sm:$0xff]  ;;  %v107_v43 = vld [vmem:[%s2802_s0 + $0x288] sm:$0xff] }
   0xa   :  { %v122_v32 = vld [vmem:[%s2802_s0 + $0x300] sm:$0xff]  ;;  %v167_v34 = vsel %vm154_vm0, %v30_v31, 0.0  ;;  %v44_v38 = vld [vmem:[%s2802_s0 + $0x90] sm:$0xff]  ;;  %v305_v40 = vsel %vm154_vm0, %v76_v37, 0.0  ;;  %v93_v44 = vld [vmem:[%s2802_s0 + $0x218] sm:$0xff]  ;;  %v398_v46 = vsel %vm154_vm0, %v107_v43, 0.0 }
   0xb   :  { %255 = vadd.xlane.f32.xlu1 %v254_v9  ;;  %258 = vadd.xlane.f32.xlu2 %v257_v10  ;;  %v443_v35 = vsel %vm154_vm0, %v122_v32, 0.0  ;;  %v62_v36 = vld [vmem:[%s2802_s0 + $0x120] sm:$0xff]  ;;  %v209_v41 = vsel %vm154_vm0, %v44_v38, 0.0  ;;  %v356_v47 = vsel %vm154_vm0, %v93_v44, 0.0  ;;  %v31_v48 = vld [vmem:[%s2802_s0 + $0x28] sm:$0xff]  ;;  %v45_v49 = vld [vmem:[%s2802_s0 + $0x98] sm:$0xff] }
   0xc   :  { %159 = vadd.xlane.f32.xlu0 %v158_v11  ;;  %v263_v39 = vsel %vm154_vm0, %v62_v36, 0.0  ;;  %v106_v42 = vld [vmem:[%s2802_s0 + $0x280] sm:$0xff]  ;;  %v124_v50 = vld [vmem:[%s2802_s0 + $0x310] sm:$0xff]  ;;  %v170_v51 = vsel %vm154_vm0, %v31_v48, 0.0  ;;  %v212_v52 = vsel %vm154_vm0, %v45_v49, 0.0  ;;  %v77_v54 = vld [vmem:[%s2802_s0 + $0x198] sm:$0xff] }
   0xd   :  { %v395_v45 = vsel %vm154_vm0, %v106_v42, 0.0  ;;  %v449_v53 = vsel %vm154_vm0, %v124_v50, 0.0  ;;  %v94_v55 = vld [vmem:[%s2802_s0 + $0x220] sm:$0xff]  ;;  %v63_v56 = vld [vmem:[%s2802_s0 + $0x128] sm:$0xff]  ;;  %v308_v57 = vsel %vm154_vm0, %v77_v54, 0.0  ;;  %v125_v60 = vld [vmem:[%s2802_s0 + $0x318] sm:$0xff] }
   0xe   :  { %v359_v58 = vsel %vm154_vm0, %v94_v55, 0.0  ;;  %v266_v59 = vsel %vm154_vm0, %v63_v56, 0.0  ;;  %v138_v61 = vld [vmem:[%s2802_s0 + $0x380] sm:$0xff]  ;;  %v108_v62 = vld [vmem:[%s2802_s0 + $0x290] sm:$0xff]  ;;  %v452_v63 = vsel %vm154_vm0, %v125_v60, 0.0  ;;  %v139_v4 = vld [vmem:[%s2802_s0 + $0x388] sm:$0xff] }
   0xf   :  { %v491_v0 = vsel %vm154_vm0, %v138_v61, 0.0  ;;  %v401_v1 = vsel %vm154_vm0, %v108_v62, 0.0  ;;  %v32_v2 = vld [vmem:[%s2802_s0 + $0x30] sm:$0xff]  ;;  %v46_v3 = vld [vmem:[%s2802_s0 + $0xa0] sm:$0xff]  ;;  %v494_v7 = vsel %vm154_vm0, %v139_v4, 0.0  ;;  %v95_v9 = vld [vmem:[%s2802_s0 + $0x228] sm:$0xff] }
  0x10   :  { %v173_v5 = vsel %vm154_vm0, %v32_v2, 0.0  ;;  %v215_v6 = vsel %vm154_vm0, %v46_v3, 0.0  ;;  %v78_v8 = vld [vmem:[%s2802_s0 + $0x1a0] sm:$0xff]  ;;  %v64_v10 = vld [vmem:[%s2802_s0 + $0x130] sm:$0xff]  ;;  %v362_v12 = vsel %vm154_vm0, %v95_v9, 0.0  ;;  %v47_v20 = vld [vmem:[%s2802_s0 + $0xa8] sm:$0xff] }
  0x11   :  { %v311_v11 = vsel %vm154_vm0, %v78_v8, 0.0  ;;  %v269_v13 = vsel %vm154_vm0, %v64_v10, 0.0  ;;  %v126_v14 = vld [vmem:[%s2802_s0 + $0x320] sm:$0xff]  ;;  %v96_v26 = vld [vmem:[%s2802_s0 + $0x230] sm:$0xff]  ;;  %v79_v31 = vld [vmem:[%s2802_s0 + $0x1a8] sm:$0xff]  ;;  %vm878_vm3 = vcmask 261312  }
  0x12   :  { %v34_v42 = vld [vmem:[%s2802_s0 + $0x40] sm:$0xff]  ;;  %v127_v43 = vld [vmem:[%s2802_s0 + $0x328] sm:$0xff]  ;;  %v80_v2 = vld [vmem:[%s2802_s0 + $0x1b0] sm:$0xff]  ;;  %vm882_vm4 = vcmask 326912   ;;  %vm886_vm5 = vcmask 392512   ;;  %vm890_vm6 = vcmask 458112  }
  0x13   :  { %351 = vadd.xlane.f32.xlu1 %v350_v15  ;;  %165 = vadd.xlane.f32.xlu2 %v164_v16  ;;  %v140_v15 = vld [vmem:[%s2802_s0 + $0x390] sm:$0xff]  ;;  %v109_v16 = vld [vmem:[%s2802_s0 + $0x298] sm:$0xff]  ;;  %vm894_vm7 = vcmask 523712   ;;  %vm898_vm8 = vcmask 589312   ;;  %vm902_vm9 = vcmask 654912   ;;  %vm906_vm10 = vcmask 720512  }
  0x14   :  { %348 = vadd.xlane.f32.xlu0 %v347_v17  ;;  %v455_v17 = vsel %vm154_vm0, %v126_v14, 0.0  ;;  %v497_v18 = vsel %vm154_vm0, %v140_v15, 0.0  ;;  %v404_v19 = vsel %vm154_vm0, %v109_v16, 0.0  ;;  %vm910_vm11 = vcmask 786112   ;;  %s1436_s28 = smov [#allocation2]   ;;  %s1387_s9 = sshll.u32 %s2809_s7, 4  ;;  %s1388_s9 = int_to_ptr.hbm [resolvable:$true] %s1387_s9 }
  0x15   :  { %vm914_vm12 = vcmask 851712   ;;  %vm918_vm13 = vcmask 917312   ;;  %vm922_vm14 = vcmask 982912   ;;  %vm926_vm15 = vcmask 1048512   ;;  %s1385_s29 = sshll.u32 %s1436_s28, 4  ;;  %s1386_s29 = int_to_ptr.vmem [resolvable:$true] %s1385_s29 }
  0x1b   :  { %207 = vadd.xlane.f32.xlu1 %v206_v21  ;;  %261 = vadd.xlane.f32.xlu2 %v260_v22  ;;  %v65_v21 = vld [vmem:[%s2802_s0 + $0x138] sm:$0xff] }
  0x1c   :  { %204 = vadd.xlane.f32.xlu0 %v203_v23  ;;  %v33_v22 = vld [vmem:[%s2802_s0 + $0x38] sm:$0xff]  ;;  %v218_v23 = vsel %vm154_vm0, %v47_v20, 0.0  ;;  %v272_v24 = vsel %vm154_vm0, %v65_v21, 0.0 }
  0x1d   :  { %v176_v25 = vsel %vm154_vm0, %v33_v22, 0.0  ;;  %v97_v22 = vld [vmem:[%s2802_s0 + $0x238] sm:$0xff] }
  0x23   :  { %303 = vadd.xlane.f32.xlu1 %v302_v27  ;;  %354 = vadd.xlane.f32.xlu2 %v353_v28  ;;  %v110_v27 = vld [vmem:[%s2802_s0 + $0x2a0] sm:$0xff]  ;;  %v865_v28 = vlaneseq }
  0x24   :  { %300 = vadd.xlane.f32.xlu0 %v299_v29 }
  0x25   :  { %v1669_v36 = vand.u32 127, %v865_v28 }
  0x27   :  { %v1672_v37 = vadd.s32 4294967280, %v1669_v36 }
  0x2b   :  { %447 = vadd.xlane.f32.xlu1 %v446_v33  ;;  %168 = vadd.xlane.f32.xlu2 %v167_v34  ;;  %v365_v33 = vsel %vm154_vm0, %v96_v26, 0.0  ;;  %v407_v34 = vsel %vm154_vm0, %v110_v27, 0.0 }
  0x2c   :  { %444 = vadd.xlane.f32.xlu0 %v443_v35  ;;  %v314_v35 = vsel %vm154_vm0, %v79_v31, 0.0  ;;  %v368_v31 = vsel %vm154_vm0, %v97_v22, 0.0 }
  0x33   :  { %264 = vadd.xlane.f32.xlu1 %v263_v39  ;;  %306 = vadd.xlane.f32.xlu2 %v305_v40  ;;  %v1675_v40 = vadd.s32 4294967288, %v1669_v36 }
  0x34   :  { %210 = vadd.xlane.f32.xlu0 %v209_v41  ;;  %v141_v41 = vld [vmem:[%s2802_s0 + $0x398] sm:$0xff] }
  0x3b   :  { %396 = vadd.xlane.f32.xlu1 %v395_v45  ;;  %399 = vadd.xlane.f32.xlu2 %v398_v46 }
  0x3c   :  { %357 = vadd.xlane.f32.xlu0 %v356_v47 }
  0x43   :  { %171 = vadd.xlane.f32.xlu1 %v170_v51  ;;  %213 = vadd.xlane.f32.xlu2 %v212_v52  ;;  %v500_v51 = vsel %vm154_vm0, %v141_v41, 0.0  ;;  %v179_v52 = vsel %vm154_vm0, %v34_v42, 0.0  ;;  %v142_v42 = vld [vmem:[%s2802_s0 + $0x3a0] sm:$0xff] }
  0x44   :  { %450 = vadd.xlane.f32.xlu0 %v449_v53  ;;  %v458_v53 = vsel %vm154_vm0, %v127_v43, 0.0 }
  0x4b   :  { %309 = vadd.xlane.f32.xlu1 %v308_v57  ;;  %360 = vadd.xlane.f32.xlu2 %v359_v58 }
  0x4c   :  { %267 = vadd.xlane.f32.xlu0 %v266_v59 }
  0x53   :  { %453 = vadd.xlane.f32.xlu1 %v452_v63  ;;  %492 = vadd.xlane.f32.xlu2 %v491_v0  ;;  %v1699_v63 = vadd.s32 4294967272, %v1669_v36 }
  0x54   :  { %402 = vadd.xlane.f32.xlu0 %v401_v1  ;;  %v66_v1 = vld [vmem:[%s2802_s0 + $0x140] sm:$0xff] }
  0x55   :  { %v275_v10 = vsel %vm154_vm0, %v66_v1, 0.0 }
  0x5b   :  { %174 = vadd.xlane.f32.xlu1 %v173_v5  ;;  %216 = vadd.xlane.f32.xlu2 %v215_v6  ;;  %v48_v5 = vld [vmem:[%s2802_s0 + $0xb0] sm:$0xff] }
  0x5c   :  { %495 = vadd.xlane.f32.xlu0 %v494_v7  ;;  %v221_v14 = vsel %vm154_vm0, %v48_v5, 0.0 }
  0x63   :  { %312 = vadd.xlane.f32.xlu1 %v311_v11  ;;  %363 = vadd.xlane.f32.xlu2 %v362_v12  ;;  %v317_v11 = vsel %vm154_vm0, %v80_v2, 0.0 }
  0x64   :  { %270 = vadd.xlane.f32.xlu0 %v269_v13 }
  0x6b   :  { %456 = vadd.xlane.f32.xlu1 %v455_v17  ;;  %498 = vadd.xlane.f32.xlu2 %v497_v18  ;;  %v111_v18 = vld [vmem:[%s2802_s0 + $0x2a8] sm:$0xff] }
  0x6c   :  { %405 = vadd.xlane.f32.xlu0 %v404_v19  ;;  %v128_v19 = vld [vmem:[%s2802_s0 + $0x330] sm:$0xff]  ;;  %v410_v27 = vsel %vm154_vm0, %v111_v18, 0.0 }
  0x6d   :  { %v461_v28 = vsel %vm154_vm0, %v128_v19, 0.0 }
  0x73   :  { %219 = vadd.xlane.f32.xlu1 %v218_v23  ;;  %273 = vadd.xlane.f32.xlu2 %v272_v24 }
  0x74   :  { %177 = vadd.xlane.f32.xlu0 %v176_v25 }
  0x76   :  { %v253_v29 = vpop.xlane.xlu1 %252  ;;  %v163_v30 = vpop.xlane.xlu2 %162 }
  0x77   :  { %v157_v32 = vpop.xlane.xlu0 %156  ;;  %v571_v38 = vmul.f32 0.015625, %v253_v29  ;;  %v541_v39 = vmul.f32 0.015625, %v163_v30 }
  0x78   :  { %v539_v44 = vmul.f32 0.015625, %v157_v32 }
  0x79   :  { %v959_v54 = vperm.slane %v571_v38, %v1669_v36  ;;  %v873_v55 = vperm.slane %v541_v39, %v1672_v37  ;;  %v49_v38 = vld [vmem:[%s2802_s0 + $0xb8] sm:$0xff] }
  0x7a   :  { %v867_v58 = vperm.slane %v539_v44, %v1669_v36 }
  0x7b   :  { %366 = vadd.xlane.f32.xlu1 %v365_v33  ;;  %408 = vadd.xlane.f32.xlu2 %v407_v34 }
  0x7c   :  { %315 = vadd.xlane.f32.xlu0 %v314_v35  ;;  %v35_v35 = vld [vmem:[%s2802_s0 + $0x48] sm:$0xff] }
  0x7e   :  { %v256_v45 = vpop.xlane.xlu1 %255  ;;  %v259_v46 = vpop.xlane.xlu2 %258 }
  0x7f   :  { %v572_v47 = vmul.f32 0.015625, %v256_v45  ;;  %v573_v48 = vmul.f32 0.015625, %v259_v46  ;;  %v160_v49 = vpop.xlane.xlu0 %159 }
  0x80   :  { %v540_v50 = vmul.f32 0.015625, %v160_v49 }
  0x81   :  { %v960_v56 = vperm.slane %v572_v47, %v1675_v40  ;;  %v962_v57 = vperm.slane %v573_v48, %v1672_v37  ;;  %v182_v47 = vsel %vm154_vm0, %v35_v35, 0.0  ;;  %v224_v48 = vsel %vm154_vm0, %v49_v38, 0.0 }
  0x82   :  { %v869_v59 = vperm.slane %v540_v50, %v1675_v40 }
  0x83   :  { %v961_v60 = vsel %vm870_vm1, %v960_v56, %v959_v54  ;;  %501 = vadd.xlane.f32.xlu1 %v500_v51  ;;  %180 = vadd.xlane.f32.xlu2 %v179_v52  ;;  %v503_v51 = vsel %vm154_vm0, %v142_v42, 0.0  ;;  %v81_v56 = vld [vmem:[%s2802_s0 + $0x1b8] sm:$0xff] }
  0x84   :  { %v963_v61 = vsel %vm874_vm2, %v962_v57, %v961_v60  ;;  %v871_v62 = vsel %vm870_vm1, %v869_v59, %v867_v58  ;;  %459 = vadd.xlane.f32.xlu0 %v458_v53  ;;  %v98_v57 = vld [vmem:[%s2802_s0 + $0x240] sm:$0xff]  ;;  %v67_v60 = vld [vmem:[%s2802_s0 + $0x148] sm:$0xff]  ;;  %v320_v2 = vsel %vm154_vm0, %v81_v56, 0.0 }
  0x85   :  { %v875_v0 = vsel %vm874_vm2, %v873_v55, %v871_v62  ;;  %v1762_v55 = vadd.s32 4294967264, %v1669_v36 }
  0x86   :  { %v352_v3 = vpop.xlane.xlu1 %351  ;;  %v166_v4 = vpop.xlane.xlu2 %165 }
  0x87   :  { %v604_v6 = vmul.f32 0.015625, %v352_v3  ;;  %v542_v7 = vmul.f32 0.015625, %v166_v4  ;;  %v349_v8 = vpop.xlane.xlu0 %348  ;;  %v371_v3 = vsel %vm154_vm0, %v98_v57, 0.0 }
  0x88   :  { %v603_v9 = vmul.f32 0.015625, %v349_v8 }
  0x89   :  { %v1022_v12 = vperm.slane %v604_v6, %v1675_v40  ;;  %v877_v13 = vperm.slane %v542_v7, %v1699_v63  ;;  %v278_v6 = vsel %vm154_vm0, %v67_v60, 0.0 }
  0x8a   :  { %v1021_v15 = vperm.slane %v603_v9, %v1669_v36 }
  0x8b   :  { %v1718_v16 = vsel %vm878_vm3, %v877_v13, %v875_v0  ;;  %276 = vadd.xlane.f32.xlu1 %v275_v10  ;;  %318 = vadd.xlane.f32.xlu2 %v317_v11  ;;  %v129_v10 = vld [vmem:[%s2802_s0 + $0x338] sm:$0xff]  ;;  %v143_v11 = vld [vmem:[%s2802_s0 + $0x3a8] sm:$0xff] }
  0x8c   :  { %v1023_v17 = vsel %vm870_vm1, %v1022_v12, %v1021_v15  ;;  %222 = vadd.xlane.f32.xlu0 %v221_v14  ;;  %v112_v14 = vld [vmem:[%s2802_s0 + $0x2b0] sm:$0xff]  ;;  %v464_v19 = vsel %vm154_vm0, %v129_v10, 0.0  ;;  %v130_v10 = vld [vmem:[%s2802_s0 + $0x340] sm:$0xff] }
  0x8e   :  { %v208_v20 = vpop.xlane.xlu1 %207  ;;  %v262_v21 = vpop.xlane.xlu2 %261 }
  0x8f   :  { %v556_v23 = vmul.f32 0.015625, %v208_v20  ;;  %v574_v24 = vmul.f32 0.015625, %v262_v21  ;;  %v205_v25 = vpop.xlane.xlu0 %204  ;;  %v506_v20 = vsel %vm154_vm0, %v143_v11, 0.0 }
  0x90   :  { %v555_v26 = vmul.f32 0.015625, %v205_v25 }
  0x91   :  { %v929_v29 = vperm.slane %v556_v23, %v1675_v40  ;;  %v964_v30 = vperm.slane %v574_v24, %v1699_v63  ;;  %v413_v23 = vsel %vm154_vm0, %v112_v14, 0.0 }
  0x92   :  { %v928_v32 = vperm.slane %v555_v26, %v1669_v36 }
  0x93   :  { %v1737_v33 = vsel %vm878_vm3, %v964_v30, %v963_v61  ;;  %411 = vadd.xlane.f32.xlu1 %v410_v27  ;;  %462 = vadd.xlane.f32.xlu2 %v461_v28  ;;  %v50_v28 = vld [vmem:[%s2802_s0 + $0xc0] sm:$0xff] }
  0x94   :  { %v1740_v34 = vsel %vm870_vm1, %v929_v29, %v928_v32  ;;  %369 = vadd.xlane.f32.xlu0 %v368_v31  ;;  %v68_v29 = vld [vmem:[%s2802_s0 + $0x150] sm:$0xff] }
  0x95   :  { %v36_v32 = vld [vmem:[%s2802_s0 + $0x50] sm:$0xff] }
  0x96   :  { %v304_v39 = vpop.xlane.xlu1 %303  ;;  %v355_v41 = vpop.xlane.xlu2 %354 }
  0x97   :  { %v588_v43 = vmul.f32 0.015625, %v304_v39  ;;  %v605_v44 = vmul.f32 0.015625, %v355_v41  ;;  %v301_v45 = vpop.xlane.xlu0 %300  ;;  %v281_v41 = vsel %vm154_vm0, %v68_v29, 0.0 }
  0x98   :  { %v587_v46 = vmul.f32 0.015625, %v301_v45 }
  0x99   :  { %v991_v49 = vperm.slane %v588_v43, %v1675_v40  ;;  %v1024_v50 = vperm.slane %v605_v44, %v1672_v37  ;;  %v185_v44 = vsel %vm154_vm0, %v36_v32, 0.0 }
  0x9a   :  { %v990_v52 = vperm.slane %v587_v46, %v1669_v36 }
  0x9b   :  { %v1758_v53 = vsel %vm874_vm2, %v1024_v50, %v1023_v17  ;;  %183 = vadd.xlane.f32.xlu1 %v182_v47  ;;  %225 = vadd.xlane.f32.xlu2 %v224_v48  ;;  %v1831_v48 = vadd.s32 4294967256, %v1669_v36  ;;  %v113_v50 = vld [vmem:[%s2802_s0 + $0x2b8] sm:$0xff] }
  0x9c   :  { %v992_v54 = vsel %vm870_vm1, %v991_v49, %v990_v52  ;;  %504 = vadd.xlane.f32.xlu0 %v503_v51  ;;  %v99_v49 = vld [vmem:[%s2802_s0 + $0x248] sm:$0xff]  ;;  %v416_v60 = vsel %vm154_vm0, %v113_v50, 0.0 }
  0x9e   :  { %v448_v58 = vpop.xlane.xlu1 %447  ;;  %v169_v59 = vpop.xlane.xlu2 %168 }
  0x9f   :  { %v636_v61 = vmul.f32 0.015625, %v448_v58  ;;  %v543_v62 = vmul.f32 0.015625, %v169_v59  ;;  %v445_v0 = vpop.xlane.xlu0 %444  ;;  %v374_v59 = vsel %vm154_vm0, %v99_v49, 0.0  ;;  %v100_v49 = vld [vmem:[%s2802_s0 + $0x250] sm:$0xff] }
  0xa0   :  { %v635_v1 = vmul.f32 0.015625, %v445_v0 }
  0xa1   :  { %v1084_v4 = vperm.slane %v636_v61, %v1675_v40  ;;  %v881_v5 = vperm.slane %v543_v62, %v1762_v55 }
  0xa2   :  { %v1083_v7 = vperm.slane %v635_v1, %v1669_v36 }
  0xa3   :  { %v1781_v8 = vsel %vm882_vm4, %v881_v5, %v1718_v16  ;;  %321 = vadd.xlane.f32.xlu1 %v320_v2  ;;  %372 = vadd.xlane.f32.xlu2 %v371_v3  ;;  %v144_v5 = vld [vmem:[%s2802_s0 + $0x3b0] sm:$0xff] }
  0xa4   :  { %v1784_v9 = vsel %vm870_vm1, %v1084_v4, %v1083_v7  ;;  %279 = vadd.xlane.f32.xlu0 %v278_v6  ;;  %v37_v6 = vld [vmem:[%s2802_s0 + $0x58] sm:$0xff] }
  0xa6   :  { %v265_v12 = vpop.xlane.xlu1 %264  ;;  %v307_v13 = vpop.xlane.xlu2 %306 }
  0xa7   :  { %v575_v15 = vmul.f32 0.015625, %v265_v12  ;;  %v589_v16 = vmul.f32 0.015625, %v307_v13  ;;  %v211_v17 = vpop.xlane.xlu0 %210 }
  0xa8   :  { %v557_v18 = vmul.f32 0.015625, %v211_v17 }
  0xa9   :  { %v966_v21 = vperm.slane %v575_v15, %v1762_v55  ;;  %v993_v22 = vperm.slane %v589_v16, %v1672_v37  ;;  %v188_v15 = vsel %vm154_vm0, %v37_v6, 0.0 }
  0xaa   :  { %v931_v24 = vperm.slane %v557_v18, %v1672_v37  ;;  %v467_v18 = vsel %vm154_vm0, %v130_v10, 0.0 }
  0xab   :  { %v1803_v25 = vsel %vm882_vm4, %v966_v21, %v1737_v33  ;;  %v1806_v26 = vsel %vm874_vm2, %v993_v22, %v992_v54  ;;  %465 = vadd.xlane.f32.xlu1 %v464_v19  ;;  %507 = vadd.xlane.f32.xlu2 %v506_v20  ;;  %v82_v54 = vld [vmem:[%s2802_s0 + $0x1c0] sm:$0xff] }
  0xac   :  { %v932_v27 = vsel %vm874_vm2, %v931_v24, %v1740_v34  ;;  %414 = vadd.xlane.f32.xlu0 %v413_v23  ;;  %v227_v34 = vsel %vm154_vm0, %v50_v28, 0.0  ;;  %v323_v0 = vsel %vm154_vm0, %v82_v54, 0.0  ;;  %v69_v23 = vld [vmem:[%s2802_s0 + $0x158] sm:$0xff]  ;;  %v83_v24 = vld [vmem:[%s2802_s0 + $0x1c8] sm:$0xff] }
  0xad   :  { %v51_v28 = vld [vmem:[%s2802_s0 + $0xc8] sm:$0xff]  ;;  %v326_v32 = vsel %vm154_vm0, %v83_v24, 0.0 }
  0xae   :  { %v397_v30 = vpop.xlane.xlu1 %396  ;;  %v400_v31 = vpop.xlane.xlu2 %399 }
  0xaf   :  { %v619_v33 = vmul.f32 0.015625, %v397_v30  ;;  %v620_v35 = vmul.f32 0.015625, %v400_v31  ;;  %v358_v38 = vpop.xlane.xlu0 %357 }
  0xb0   :  { %v606_v39 = vmul.f32 0.015625, %v358_v38 }
  0xb1   :  { %v1052_v42 = vperm.slane %v619_v33, %v1669_v36  ;;  %v1053_v43 = vperm.slane %v620_v35, %v1675_v40  ;;  %v230_v35 = vsel %vm154_vm0, %v51_v28, 0.0 }
  0xb2   :  { %v1026_v45 = vperm.slane %v606_v39, %v1699_v63 }
  0xb3   :  { %v1826_v46 = vsel %vm870_vm1, %v1053_v43, %v1052_v42  ;;  %228 = vadd.xlane.f32.xlu1 %v227_v34  ;;  %282 = vadd.xlane.f32.xlu2 %v281_v41  ;;  %v1905_v42 = vadd.s32 4294967248, %v1669_v36  ;;  %v114_v43 = vld [vmem:[%s2802_s0 + $0x2c0] sm:$0xff] }
  0xb4   :  { %v1027_v47 = vsel %vm878_vm3, %v1026_v45, %v1758_v53  ;;  %186 = vadd.xlane.f32.xlu0 %v185_v44  ;;  %v131_v44 = vld [vmem:[%s2802_s0 + $0x348] sm:$0xff] }
  0xb6   :  { %v172_v51 = vpop.xlane.xlu1 %171  ;;  %v214_v52 = vpop.xlane.xlu2 %213 }
  0xb7   :  { %v544_v56 = vmul.f32 0.015625, %v172_v51  ;;  %v558_v53 = vmul.f32 0.015625, %v214_v52  ;;  %v451_v57 = vpop.xlane.xlu0 %450 }
  0xb8   :  { %v637_v58 = vmul.f32 0.015625, %v451_v57 }
  0xb9   :  { %v885_v61 = vperm.slane %v544_v56, %v1831_v48  ;;  %v933_v62 = vperm.slane %v558_v53, %v1699_v63  ;;  %v419_v56 = vsel %vm154_vm0, %v114_v43, 0.0  ;;  %v470_v53 = vsel %vm154_vm0, %v131_v44, 0.0 }
  0xba   :  { %v1086_v1 = vperm.slane %v637_v58, %v1672_v37 }
  0xbb   :  { %v1850_v2 = vsel %vm886_vm5, %v885_v61, %v1781_v8  ;;  %v1853_v3 = vsel %vm878_vm3, %v933_v62, %v932_v27  ;;  %375 = vadd.xlane.f32.xlu1 %v374_v59  ;;  %417 = vadd.xlane.f32.xlu2 %v416_v60  ;;  %v377_v59 = vsel %vm154_vm0, %v100_v49, 0.0 }
  0xbc   :  { %v1087_v4 = vsel %vm874_vm2, %v1086_v1, %v1784_v9  ;;  %324 = vadd.xlane.f32.xlu0 %v323_v0  ;;  %v509_v9 = vsel %vm154_vm0, %v144_v5, 0.0  ;;  %v38_v1 = vld [vmem:[%s2802_s0 + $0x60] sm:$0xff] }
  0xbd   :  { %v191_v10 = vsel %vm154_vm0, %v38_v1, 0.0 }
  0xbe   :  { %v310_v7 = vpop.xlane.xlu1 %309  ;;  %v361_v8 = vpop.xlane.xlu2 %360 }
  0xbf   :  { %v590_v11 = vmul.f32 0.015625, %v310_v7  ;;  %v607_v12 = vmul.f32 0.015625, %v361_v8  ;;  %v268_v13 = vpop.xlane.xlu0 %267 }
  0xc0   :  { %v576_v14 = vmul.f32 0.015625, %v268_v13 }
  0xc1   :  { %v995_v16 = vperm.slane %v590_v11, %v1699_v63  ;;  %v1028_v17 = vperm.slane %v607_v12, %v1762_v55 }
  0xc2   :  { %v968_v19 = vperm.slane %v576_v14, %v1831_v48 }
  0xc3   :  { %v1874_v20 = vsel %vm878_vm3, %v995_v16, %v1806_v26  ;;  %v1877_v21 = vsel %vm882_vm4, %v1028_v17, %v1027_v47  ;;  %510 = vadd.xlane.f32.xlu1 %v509_v9  ;;  %189 = vadd.xlane.f32.xlu2 %v188_v15 }
  0xc4   :  { %v1881_v22 = vsel %vm886_vm5, %v968_v19, %v1803_v25  ;;  %468 = vadd.xlane.f32.xlu0 %v467_v18  ;;  %v284_v25 = vsel %vm154_vm0, %v69_v23, 0.0  ;;  %v84_v18 = vld [vmem:[%s2802_s0 + $0x1d0] sm:$0xff]  ;;  %v101_v19 = vld [vmem:[%s2802_s0 + $0x258] sm:$0xff] }
  0xc6   :  { %v454_v26 = vpop.xlane.xlu1 %453  ;;  %v493_v27 = vpop.xlane.xlu2 %492 }
  0xc7   :  { %v638_v29 = vmul.f32 0.015625, %v454_v26  ;;  %v403_v30 = vpop.xlane.xlu0 %402  ;;  %v651_v34 = vmul.f32 0.015625, %v493_v27 }
  0xc8   :  { %v621_v31 = vmul.f32 0.015625, %v403_v30 }
  0xc9   :  { %v1088_v33 = vperm.slane %v638_v29, %v1699_v63  ;;  %v1114_v52 = vperm.slane %v651_v34, %v1669_v36  ;;  %v380_v29 = vsel %vm154_vm0, %v101_v19, 0.0  ;;  %v1982_v34 = vadd.s32 4294967240, %v1669_v36 }
  0xca   :  { %v1055_v38 = vperm.slane %v621_v31, %v1672_v37 }
  0xcb   :  { %v1898_v39 = vsel %vm878_vm3, %v1088_v33, %v1087_v4  ;;  %285 = vadd.xlane.f32.xlu1 %v284_v25  ;;  %327 = vadd.xlane.f32.xlu2 %v326_v32 }
  0xcc   :  { %v1902_v41 = vsel %vm874_vm2, %v1055_v38, %v1826_v46  ;;  %231 = vadd.xlane.f32.xlu0 %v230_v35 }
  0xce   :  { %v175_v45 = vpop.xlane.xlu1 %174  ;;  %v217_v47 = vpop.xlane.xlu2 %216 }
  0xcf   :  { %v545_v46 = vmul.f32 0.015625, %v175_v45  ;;  %v559_v50 = vmul.f32 0.015625, %v217_v47  ;;  %v496_v51 = vpop.xlane.xlu0 %495  ;;  %v115_v45 = vld [vmem:[%s2802_s0 + $0x2c8] sm:$0xff] }
  0xd0   :  { %v652_v54 = vmul.f32 0.015625, %v496_v51 }
  0xd1   :  { %v889_v57 = vperm.slane %v545_v46, %v1905_v42  ;;  %v935_v58 = vperm.slane %v559_v50, %v1762_v55 }
  0xd2   :  { %v1115_v60 = vperm.slane %v652_v54, %v1675_v40  ;;  %v52_v40 = vld [vmem:[%s2802_s0 + $0xd0] sm:$0xff] }
  0xd3   :  { %v1925_v61 = vsel %vm890_vm6, %v889_v57, %v1850_v2  ;;  %v1929_v62 = vsel %vm882_vm4, %v935_v58, %v1853_v3  ;;  %420 = vadd.xlane.f32.xlu1 %v419_v56  ;;  %471 = vadd.xlane.f32.xlu2 %v470_v53  ;;  %v145_v3 = vld [vmem:[%s2802_s0 + $0x3b8] sm:$0xff]  ;;  %v233_v11 = vsel %vm154_vm0, %v52_v40, 0.0  ;;  %v422_v56 = vsel %vm154_vm0, %v115_v45, 0.0  ;;  %v39_v40 = vld [vmem:[%s2802_s0 + $0x68] sm:$0xff] }
  0xd4   :  { %v1116_v0 = vsel %vm870_vm1, %v1115_v60, %v1114_v52  ;;  %378 = vadd.xlane.f32.xlu0 %v377_v59  ;;  %v512_v14 = vsel %vm154_vm0, %v145_v3, 0.0  ;;  %v53_v60 = vld [vmem:[%s2802_s0 + $0xd8] sm:$0xff]  ;;  %vm1147_vm1 = vcmask 1042434  }
  0xd6   :  { %v313_v4 = vpop.xlane.xlu1 %312  ;;  %v364_v2 = vpop.xlane.xlu2 %363 }
  0xd7   :  { %v591_v5 = vmul.f32 0.015625, %v313_v4  ;;  %v608_v6 = vmul.f32 0.015625, %v364_v2  ;;  %v271_v7 = vpop.xlane.xlu0 %270 }
  0xd8   :  { %v577_v8 = vmul.f32 0.015625, %v271_v7 }
  0xd9   :  { %v997_v12 = vperm.slane %v591_v5, %v1762_v55  ;;  %v1030_v13 = vperm.slane %v608_v6, %v1831_v48 }
  0xda   :  { %v970_v9 = vperm.slane %v577_v8, %v1905_v42 }
  0xdb   :  { %v1949_v15 = vsel %vm882_vm4, %v997_v12, %v1874_v20  ;;  %v1953_v16 = vsel %vm886_vm5, %v1030_v13, %v1877_v21  ;;  %192 = vadd.xlane.f32.xlu1 %v191_v10  ;;  %234 = vadd.xlane.f32.xlu2 %v233_v11  ;;  %v70_v21 = vld [vmem:[%s2802_s0 + $0x160] sm:$0xff]  ;;  %v194_v10 = vsel %vm154_vm0, %v39_v40, 0.0 }
  0xdc   :  { %v971_v17 = vsel %vm890_vm6, %v970_v9, %v1881_v22  ;;  %513 = vadd.xlane.f32.xlu0 %v512_v14  ;;  %v329_v22 = vsel %vm154_vm0, %v84_v18, 0.0  ;;  %v287_v25 = vsel %vm154_vm0, %v70_v21, 0.0  ;;  %v2033_v9 = vadd.s32 4294967232, %v1669_v36 }
  0xde   :  { %v457_v20 = vpop.xlane.xlu1 %456  ;;  %v499_v23 = vpop.xlane.xlu2 %498 }
  0xdf   :  { %v639_v24 = vmul.f32 0.015625, %v457_v20  ;;  %v653_v26 = vmul.f32 0.015625, %v499_v23  ;;  %v406_v27 = vpop.xlane.xlu0 %405  ;;  %v85_v20 = vld [vmem:[%s2802_s0 + $0x1d8] sm:$0xff] }
  0xe0   :  { %v622_v28 = vmul.f32 0.015625, %v406_v27 }
  0xe1   :  { %v1090_v30 = vperm.slane %v639_v24, %v1762_v55  ;;  %v1117_v31 = vperm.slane %v653_v26, %v1672_v37  ;;  %v132_v37 = vld [vmem:[%s2802_s0 + $0x350] sm:$0xff] }
  0xe2   :  { %v1057_v32 = vperm.slane %v622_v28, %v1699_v63  ;;  %v473_v50 = vsel %vm154_vm0, %v132_v37, 0.0 }
  0xe3   :  { %v1974_v33 = vsel %vm882_vm4, %v1090_v30, %v1898_v39  ;;  %v1977_v35 = vsel %vm874_vm2, %v1117_v31, %v1116_v0  ;;  %330 = vadd.xlane.f32.xlu1 %v329_v22  ;;  %381 = vadd.xlane.f32.xlu2 %v380_v29  ;;  %v146_v39 = vld [vmem:[%s2802_s0 + $0x3c0] sm:$0xff]  ;;  %v71_v0 = vld [vmem:[%s2802_s0 + $0x168] sm:$0xff]  ;;  %v332_v29 = vsel %vm154_vm0, %v85_v20, 0.0  ;;  %vm1149_vm2 = vcmask 1043459  }
  0xe4   :  { %v1058_v38 = vsel %vm878_vm3, %v1057_v32, %v1902_v41  ;;  %288 = vadd.xlane.f32.xlu0 %v287_v25  ;;  %v515_v51 = vsel %vm154_vm0, %v146_v39, 0.0  ;;  %v290_v6 = vsel %vm154_vm0, %v71_v0, 0.0  ;;  %v133_v39 = vld [vmem:[%s2802_s0 + $0x358] sm:$0xff]  ;;  %v54_v0 = vld [vmem:[%s2802_s0 + $0xe0] sm:$0xff] }
  0xe6   :  { %v220_v43 = vpop.xlane.xlu1 %219  ;;  %v274_v44 = vpop.xlane.xlu2 %273 }
  0xe7   :  { %v560_v47 = vmul.f32 0.015625, %v220_v43  ;;  %v578_v41 = vmul.f32 0.015625, %v274_v44  ;;  %v178_v49 = vpop.xlane.xlu0 %177 }
  0xe8   :  { %v546_v46 = vmul.f32 0.015625, %v178_v49 }
  0xe9   :  { %v937_v52 = vperm.slane %v560_v47, %v1831_v48  ;;  %v972_v54 = vperm.slane %v578_v41, %v1982_v34 }
  0xea   :  { %v893_v53 = vperm.slane %v546_v46, %v1982_v34 }
  0xeb   :  { %v2001_v57 = vsel %vm886_vm5, %v937_v52, %v1929_v62  ;;  %v2004_v58 = vsel %vm894_vm7, %v972_v54, %v971_v17  ;;  %474 = vadd.xlane.f32.xlu1 %v473_v50  ;;  %516 = vadd.xlane.f32.xlu2 %v515_v51  ;;  %v102_v17 = vld [vmem:[%s2802_s0 + $0x260] sm:$0xff]  ;;  %v476_v50 = vsel %vm154_vm0, %v133_v39, 0.0 }
  0xec   :  { %v895_v59 = vsel %vm894_vm7, %v893_v53, %v1925_v61  ;;  %423 = vadd.xlane.f32.xlu0 %v422_v56  ;;  %v236_v61 = vsel %vm154_vm0, %v53_v60, 0.0  ;;  %v383_v26 = vsel %vm154_vm0, %v102_v17, 0.0  ;;  %v72_v53 = vld [vmem:[%s2802_s0 + $0x170] sm:$0xff] }
  0xee   :  { %v367_v1 = vpop.xlane.xlu1 %366  ;;  %v409_v62 = vpop.xlane.xlu2 %408 }
  0xef   :  { %v609_v4 = vmul.f32 0.015625, %v367_v1  ;;  %v623_v2 = vmul.f32 0.015625, %v409_v62  ;;  %v316_v3 = vpop.xlane.xlu0 %315 }
  0xf0   :  { %v592_v5 = vmul.f32 0.015625, %v316_v3 }
  0xf1   :  { %v1032_v7 = vperm.slane %v609_v4, %v1905_v42  ;;  %v1059_v8 = vperm.slane %v623_v2, %v1762_v55 }
  0xf2   :  { %v999_v11 = vperm.slane %v592_v5, %v1831_v48 }
  0xf3   :  { %v2025_v12 = vsel %vm890_vm6, %v1032_v7, %v1953_v16  ;;  %v2028_v13 = vsel %vm882_vm4, %v1059_v8, %v1058_v38  ;;  %237 = vadd.xlane.f32.xlu1 %v236_v61  ;;  %291 = vadd.xlane.f32.xlu2 %v290_v6  ;;  %v116_v16 = vld [vmem:[%s2802_s0 + $0x2d0] sm:$0xff]  ;;  %v239_v61 = vsel %vm154_vm0, %v54_v0, 0.0 }
  0xf4   :  { %v1000_v14 = vsel %vm886_vm5, %v999_v11, %v1949_v15  ;;  %195 = vadd.xlane.f32.xlu0 %v194_v10  ;;  %v425_v27 = vsel %vm154_vm0, %v116_v16, 0.0  ;;  %v40_v38 = vld [vmem:[%s2802_s0 + $0x70] sm:$0xff]  ;;  %v2108_v11 = vadd.s32 4294967224, %v1669_v36 }
  0xf5   :  { %v197_v41 = vsel %vm154_vm0, %v40_v38, 0.0  ;;  %v148_v38 = vld [vmem:[%s2802_s0 + $0x3d0] sm:$0xff] }
  0xf6   :  { %v502_v18 = vpop.xlane.xlu1 %501  ;;  %v181_v19 = vpop.xlane.xlu2 %180 }
  0xf7   :  { %v654_v23 = vmul.f32 0.015625, %v502_v18  ;;  %v547_v15 = vmul.f32 0.015625, %v181_v19  ;;  %v460_v21 = vpop.xlane.xlu0 %459  ;;  %v103_v18 = vld [vmem:[%s2802_s0 + $0x268] sm:$0xff] }
  0xf8   :  { %v640_v24 = vmul.f32 0.015625, %v460_v21 }
  0xf9   :  { %v1119_v28 = vperm.slane %v654_v23, %v1699_v63  ;;  %v897_v22 = vperm.slane %v547_v15, %v2033_v9  ;;  %v147_v63 = vld [vmem:[%s2802_s0 + $0x3c8] sm:$0xff] }
  0xfa   :  { %v1092_v30 = vperm.slane %v640_v24, %v1831_v48 }
  0xfb   :  { %v2052_v31 = vsel %vm878_vm3, %v1119_v28, %v1977_v35  ;;  %v2055_v25 = vsel %vm898_vm8, %v897_v22, %v895_v59  ;;  %384 = vadd.xlane.f32.xlu1 %v383_v26  ;;  %426 = vadd.xlane.f32.xlu2 %v425_v27  ;;  %v86_v59 = vld [vmem:[%s2802_s0 + $0x1e0] sm:$0xff]  ;;  %v386_v27 = vsel %vm154_vm0, %v103_v18, 0.0  ;;  %vm1338_vm3 = vcmask 27648  }
  0xfc   :  { %v1093_v32 = vsel %vm886_vm5, %v1092_v30, %v1974_v33  ;;  %333 = vadd.xlane.f32.xlu0 %v332_v29  ;;  %v518_v33 = vsel %vm154_vm0, %v147_v63, 0.0  ;;  %v335_v2 = vsel %vm154_vm0, %v86_v59, 0.0  ;;  %v73_v59 = vld [vmem:[%s2802_s0 + $0x178] sm:$0xff] }
  0xfe   :  { %v277_v37 = vpop.xlane.xlu1 %276  ;;  %v319_v35 = vpop.xlane.xlu2 %318 }
  0xff   :  { %v579_v43 = vmul.f32 0.015625, %v277_v37  ;;  %v593_v44 = vmul.f32 0.015625, %v319_v35  ;;  %v223_v45 = vpop.xlane.xlu0 %222 }
 0x100   :  { %v561_v47 = vmul.f32 0.015625, %v223_v45 }
 0x101   :  { %v974_v49 = vperm.slane %v579_v43, %v2033_v9  ;;  %v1001_v46 = vperm.slane %v593_v44, %v1905_v42 }
 0x102   :  { %v939_v51 = vperm.slane %v561_v47, %v1905_v42 }
 0x103   :  { %v2076_v52 = vsel %vm898_vm8, %v974_v49, %v2004_v58  ;;  %v2079_v54 = vsel %vm890_vm6, %v1001_v46, %v1000_v14  ;;  %519 = vadd.xlane.f32.xlu1 %v518_v33  ;;  %198 = vadd.xlane.f32.xlu2 %v197_v41  ;;  %v117_v14 = vld [vmem:[%s2802_s0 + $0x2d8] sm:$0xff]  ;;  %v521_v33 = vsel %vm154_vm0, %v148_v38, 0.0 }
 0x104   :  { %v940_v56 = vsel %vm890_vm6, %v939_v51, %v2001_v57  ;;  %477 = vadd.xlane.f32.xlu0 %v476_v50  ;;  %v293_v57 = vsel %vm154_vm0, %v72_v53, 0.0  ;;  %v428_v15 = vsel %vm154_vm0, %v117_v14, 0.0  ;;  %v87_v51 = vld [vmem:[%s2802_s0 + $0x1e8] sm:$0xff] }
 0x106   :  { %v412_v60 = vpop.xlane.xlu1 %411  ;;  %v463_v58 = vpop.xlane.xlu2 %462 }
 0x107   :  { %v624_v1 = vmul.f32 0.015625, %v412_v60  ;;  %v641_v62 = vmul.f32 0.015625, %v463_v58  ;;  %v370_v40 = vpop.xlane.xlu0 %369 }
 0x108   :  { %v610_v4 = vmul.f32 0.015625, %v370_v40 }
 0x109   :  { %v1061_v3 = vperm.slane %v624_v1, %v1831_v48  ;;  %v1094_v5 = vperm.slane %v641_v62, %v1905_v42 }
 0x10a   :  { %v1034_v6 = vperm.slane %v610_v4, %v1982_v34 }
 0x10b   :  { %v2100_v7 = vsel %vm886_vm5, %v1061_v3, %v2028_v13  ;;  %v2103_v8 = vsel %vm890_vm6, %v1094_v5, %v1093_v32  ;;  %294 = vadd.xlane.f32.xlu1 %v293_v57  ;;  %336 = vadd.xlane.f32.xlu2 %v335_v2  ;;  %v134_v13 = vld [vmem:[%s2802_s0 + $0x360] sm:$0xff]  ;;  %v41_v32 = vld [vmem:[%s2802_s0 + $0x78] sm:$0xff]  ;;  %v296_v57 = vsel %vm154_vm0, %v73_v59, 0.0 }
 0x10c   :  { %v1035_v10 = vsel %vm894_vm7, %v1034_v6, %v2025_v12  ;;  %240 = vadd.xlane.f32.xlu0 %v239_v61  ;;  %v479_v21 = vsel %vm154_vm0, %v134_v13, 0.0  ;;  %v2183_v6 = vadd.s32 4294967216, %v1669_v36  ;;  %v118_v13 = vld [vmem:[%s2802_s0 + $0x2e0] sm:$0xff] }
 0x10e   :  { %v184_v17 = vpop.xlane.xlu1 %183  ;;  %v226_v16 = vpop.xlane.xlu2 %225 }
 0x10f   :  { %v548_v19 = vmul.f32 0.015625, %v184_v17  ;;  %v562_v12 = vmul.f32 0.015625, %v226_v16  ;;  %v505_v20 = vpop.xlane.xlu0 %504 }
 0x110   :  { %v655_v23 = vmul.f32 0.015625, %v505_v20 }
 0x111   :  { %v901_v24 = vperm.slane %v548_v19, %v2108_v11  ;;  %v941_v26 = vperm.slane %v562_v12, %v1982_v34 }
 0x112   :  { %v1121_v28 = vperm.slane %v655_v23, %v1762_v55  ;;  %v55_v55 = vld [vmem:[%s2802_s0 + $0xe8] sm:$0xff] }
 0x113   :  { %v2127_v22 = vsel %vm902_vm9, %v901_v24, %v2055_v25  ;;  %v2130_v29 = vsel %vm894_vm7, %v941_v26, %v940_v56  ;;  %429 = vadd.xlane.f32.xlu1 %v428_v15  ;;  %480 = vadd.xlane.f32.xlu2 %v479_v21  ;;  %v242_v44 = vsel %vm154_vm0, %v55_v55, 0.0  ;;  %v104_v56 = vld [vmem:[%s2802_s0 + $0x270] sm:$0xff]  ;;  %v431_v15 = vsel %vm154_vm0, %v118_v13, 0.0 }
 0x114   :  { %v1122_v30 = vsel %vm882_vm4, %v1121_v28, %v2052_v31  ;;  %387 = vadd.xlane.f32.xlu0 %v386_v27  ;;  %v200_v31 = vsel %vm154_vm0, %v41_v32, 0.0  ;;  %v389_v62 = vsel %vm154_vm0, %v104_v56, 0.0  ;;  %v88_v28 = vld [vmem:[%s2802_s0 + $0x1f0] sm:$0xff]  ;;  %vm1247_vm4 = vcmask 1043456  }
 0x115   :  { %v56_v55 = vld [vmem:[%s2802_s0 + $0xf0] sm:$0xff] }
 0x116   :  { %v322_v63 = vpop.xlane.xlu1 %321  ;;  %v373_v25 = vpop.xlane.xlu2 %372 }
 0x117   :  { %v594_v37 = vmul.f32 0.015625, %v322_v63  ;;  %v611_v35 = vmul.f32 0.015625, %v373_v25  ;;  %v280_v39 = vpop.xlane.xlu0 %279 }
 0x118   :  { %v580_v43 = vmul.f32 0.015625, %v280_v39 }
 0x119   :  { %v1003_v45 = vperm.slane %v594_v37, %v1982_v34  ;;  %v1036_v47 = vperm.slane %v611_v35, %v2033_v9 }
 0x11a   :  { %v976_v41 = vperm.slane %v580_v43, %v2108_v11 }
 0x11b   :  { %v2151_v49 = vsel %vm894_vm7, %v1003_v45, %v2079_v54  ;;  %v2154_v46 = vsel %vm898_vm8, %v1036_v47, %v1035_v10  ;;  %201 = vadd.xlane.f32.xlu1 %v200_v31  ;;  %243 = vadd.xlane.f32.xlu2 %v242_v44  ;;  %v245_v31 = vsel %vm154_vm0, %v56_v55, 0.0 }
 0x11c   :  { %v977_v50 = vsel %vm902_vm9, %v976_v41, %v2076_v52  ;;  %522 = vadd.xlane.f32.xlu0 %v521_v33  ;;  %v338_v52 = vsel %vm154_vm0, %v87_v51, 0.0  ;;  %v2234_v41 = vadd.s32 4294967208, %v1669_v36 }
 0x11e   :  { %v466_v53 = vpop.xlane.xlu1 %465  ;;  %v508_v54 = vpop.xlane.xlu2 %507 }
 0x11f   :  { %v642_v60 = vmul.f32 0.015625, %v466_v53  ;;  %v656_v58 = vmul.f32 0.015625, %v508_v54  ;;  %v415_v0 = vpop.xlane.xlu0 %414  ;;  %v119_v53 = vld [vmem:[%s2802_s0 + $0x2e8] sm:$0xff] }
 0x120   :  { %v625_v1 = vmul.f32 0.015625, %v415_v0 }
 0x121   :  { %v1096_v40 = vperm.slane %v642_v60, %v1982_v34  ;;  %v1123_v4 = vperm.slane %v656_v58, %v1831_v48  ;;  %v135_v48 = vld [vmem:[%s2802_s0 + $0x368] sm:$0xff] }
 0x122   :  { %v1063_v2 = vperm.slane %v625_v1, %v1905_v42  ;;  %v482_v19 = vsel %vm154_vm0, %v135_v48, 0.0 }
 0x123   :  { %v2175_v3 = vsel %vm894_vm7, %v1096_v40, %v2103_v8  ;;  %v2178_v5 = vsel %vm886_vm5, %v1123_v4, %v1122_v30  ;;  %339 = vadd.xlane.f32.xlu1 %v338_v52  ;;  %390 = vadd.xlane.f32.xlu2 %v389_v62  ;;  %v149_v8 = vld [vmem:[%s2802_s0 + $0x3d8] sm:$0xff]  ;;  %v434_v62 = vsel %vm154_vm0, %v119_v53, 0.0  ;;  %vm1260_vm5 = vcmask 0  }
 0x124   :  { %v1064_v61 = vsel %vm890_vm6, %v1063_v2, %v2100_v7  ;;  %297 = vadd.xlane.f32.xlu0 %v296_v57  ;;  %v524_v12 = vsel %vm154_vm0, %v149_v8, 0.0  ;;  %v105_v30 = vld [vmem:[%s2802_s0 + $0x278] sm:$0xff] }
 0x125   :  { %v392_v35 = vsel %vm154_vm0, %v105_v30, 0.0  ;;  %v57_v8 = vld [vmem:[%s2802_s0 + $0xf8] sm:$0xff] }
 0x126   :  { %v229_v10 = vpop.xlane.xlu1 %228  ;;  %v283_v14 = vpop.xlane.xlu2 %282 }
 0x127   :  { %v563_v17 = vmul.f32 0.015625, %v229_v10  ;;  %v581_v7 = vmul.f32 0.015625, %v283_v14  ;;  %v187_v16 = vpop.xlane.xlu0 %186 }
 0x128   :  { %v549_v18 = vmul.f32 0.015625, %v187_v16 }
 0x129   :  { %v943_v20 = vperm.slane %v563_v17, %v2033_v9  ;;  %v978_v23 = vperm.slane %v581_v7, %v2183_v6 }
 0x12a   :  { %v905_v21 = vperm.slane %v549_v18, %v2183_v6 }
 0x12b   :  { %v2202_v24 = vsel %vm898_vm8, %v943_v20, %v2130_v29  ;;  %v2205_v26 = vsel %vm906_vm10, %v978_v23, %v977_v50  ;;  %483 = vadd.xlane.f32.xlu1 %v482_v19  ;;  %525 = vadd.xlane.f32.xlu2 %v524_v12  ;;  %v136_v50 = vld [vmem:[%s2802_s0 + $0x370] sm:$0xff]  ;;  %v248_v19 = vsel %vm154_vm0, %v57_v8, 0.0 }
 0x12c   :  { %v907_v27 = vsel %vm906_vm10, %v905_v21, %v2127_v22  ;;  %432 = vadd.xlane.f32.xlu0 %v431_v15  ;;  %v341_v22 = vsel %vm154_vm0, %v88_v28, 0.0  ;;  %v485_v58 = vsel %vm154_vm0, %v136_v50, 0.0  ;;  %v151_v21 = vld [vmem:[%s2802_s0 + $0x3e8] sm:$0xff] }
 0x12e   :  { %v376_v32 = vpop.xlane.xlu1 %375  ;;  %v418_v29 = vpop.xlane.xlu2 %417 }
 0x12f   :  { %v612_v63 = vmul.f32 0.015625, %v376_v32  ;;  %v626_v25 = vmul.f32 0.015625, %v418_v29  ;;  %v325_v38 = vpop.xlane.xlu0 %324 }
 0x130   :  { %v595_v37 = vmul.f32 0.015625, %v325_v38 }
 0x131   :  { %v1038_v39 = vperm.slane %v612_v63, %v2108_v11  ;;  %v1065_v43 = vperm.slane %v626_v25, %v1982_v34 }
 0x132   :  { %v1005_v44 = vperm.slane %v595_v37, %v2033_v9 }
 0x133   :  { %v2226_v45 = vsel %vm902_vm9, %v1038_v39, %v2154_v46  ;;  %v2229_v47 = vsel %vm894_vm7, %v1065_v43, %v1064_v61  ;;  %342 = vadd.xlane.f32.xlu1 %v341_v22  ;;  %393 = vadd.xlane.f32.xlu2 %v392_v35  ;;  %v150_v46 = vld [vmem:[%s2802_s0 + $0x3e0] sm:$0xff]  ;;  %v120_v61 = vld [vmem:[%s2802_s0 + $0x2f0] sm:$0xff] }
 0x134   :  { %v1006_v33 = vsel %vm898_vm8, %v1005_v44, %v2151_v49  ;;  %246 = vadd.xlane.f32.xlu0 %v245_v31  ;;  %v527_v0 = vsel %vm154_vm0, %v150_v46, 0.0  ;;  %v437_v7 = vsel %vm154_vm0, %v120_v61, 0.0  ;;  %v2301_v44 = vadd.s32 4294967200, %v1669_v36 }
 0x136   :  { %v511_v51 = vpop.xlane.xlu1 %510  ;;  %v190_v56 = vpop.xlane.xlu2 %189 }
 0x137   :  { %v657_v54 = vmul.f32 0.015625, %v511_v51  ;;  %v550_v49 = vmul.f32 0.015625, %v190_v56  ;;  %v469_v59 = vpop.xlane.xlu0 %468 }
 0x138   :  { %v643_v60 = vmul.f32 0.015625, %v469_v59 }
 0x139   :  { %v1125_v1 = vperm.slane %v657_v54, %v1905_v42  ;;  %v909_v52 = vperm.slane %v550_v49, %v2234_v41  ;;  %v89_v42 = vld [vmem:[%s2802_s0 + $0x1f8] sm:$0xff] }
 0x13a   :  { %v1098_v40 = vperm.slane %v643_v60, %v2033_v9 }
 0x13b   :  { %v2253_v4 = vsel %vm890_vm6, %v1125_v1, %v2178_v5  ;;  %v2256_v57 = vsel %vm910_vm11, %v909_v52, %v907_v27  ;;  %486 = vadd.xlane.f32.xlu1 %v485_v58  ;;  %528 = vadd.xlane.f32.xlu2 %v527_v0  ;;  %v121_v27 = vld [vmem:[%s2802_s0 + $0x2f8] sm:$0xff]  ;;  %vm1350_vm6 = vcmask 31744  }
 0x13c   :  { %v1099_v2 = vsel %vm898_vm8, %v1098_v40, %v2175_v3  ;;  %435 = vadd.xlane.f32.xlu0 %v434_v62  ;;  %v344_v3 = vsel %vm154_vm0, %v89_v42, 0.0  ;;  %v440_v25 = vsel %vm154_vm0, %v121_v27, 0.0 }
 0x13e   :  { %v286_v48 = vpop.xlane.xlu1 %285  ;;  %v328_v5 = vpop.xlane.xlu2 %327 }
 0x13f   :  { %v582_v10 = vmul.f32 0.015625, %v286_v48  ;;  %v596_v14 = vmul.f32 0.015625, %v328_v5  ;;  %v232_v13 = vpop.xlane.xlu0 %231 }
 0x140   :  { %v564_v17 = vmul.f32 0.015625, %v232_v13 }
 0x141   :  { %v980_v16 = vperm.slane %v582_v10, %v2234_v41  ;;  %v1007_v18 = vperm.slane %v596_v14, %v2108_v11 }
 0x142   :  { %v945_v12 = vperm.slane %v564_v17, %v2108_v11 }
 0x143   :  { %v981_v20 = vsel %vm910_vm11, %v980_v16, %v2205_v26  ;;  %v1008_v23 = vsel %vm902_vm9, %v1007_v18, %v1006_v33  ;;  %345 = vadd.xlane.f32.xlu1 %v344_v3  ;;  %438 = vadd.xlane.f32.xlu2 %v437_v7  ;;  %v137_v26 = vld [vmem:[%s2802_s0 + $0x378] sm:$0xff] }
 0x144   :  { %v946_v15 = vsel %vm902_vm9, %v945_v12, %v2202_v24  ;;  %249 = vadd.xlane.f32.xlu0 %v248_v19  ;;  %v530_v24 = vsel %vm154_vm0, %v151_v21, 0.0  ;;  %v488_v22 = vsel %vm154_vm0, %v137_v26, 0.0  ;;  %v153_v33 = vld [vmem:[%s2802_s0 + $0x3f8] sm:$0xff] }
 0x146   :  { %v421_v28 = vpop.xlane.xlu1 %420  ;;  %v472_v30 = vpop.xlane.xlu2 %471 }
 0x147   :  { %v627_v32 = vmul.f32 0.015625, %v421_v28  ;;  %v644_v29 = vmul.f32 0.015625, %v472_v30  ;;  %v379_v55 = vpop.xlane.xlu0 %378 }
 0x148   :  { %v613_v63 = vmul.f32 0.015625, %v379_v55 }
 0x149   :  { %v1067_v38 = vperm.slane %v627_v32, %v2033_v9  ;;  %v1100_v37 = vperm.slane %v644_v29, %v2108_v11 }
 0x14a   :  { %v1040_v35 = vperm.slane %v613_v63, %v2183_v6 }
 0x14b   :  { %v1068_v39 = vsel %vm898_vm8, %v1067_v38, %v2229_v47  ;;  %v1101_v43 = vsel %vm902_vm9, %v1100_v37, %v1099_v2  ;;  %531 = vadd.xlane.f32.xlu1 %v530_v24  ;;  %441 = vadd.xlane.f32.xlu2 %v440_v25  ;;  %v152_v47 = vld [vmem:[%s2802_s0 + $0x3f0] sm:$0xff] }
 0x14c   :  { %v1041_v31 = vsel %vm906_vm10, %v1040_v35, %v2226_v45  ;;  %489 = vadd.xlane.f32.xlu0 %v488_v22  ;;  %v536_v45 = vsel %vm154_vm0, %v153_v33, 0.0  ;;  %v533_v60 = vsel %vm154_vm0, %v152_v47, 0.0  ;;  %v695_v47 = vld [vmem:[%s2803_s1 + $0xe0] sm:$0xff]  ;;  %vm1145_vm0 = vcmask 1041409  }
 0x14e   :  { %v193_v50 = vpop.xlane.xlu1 %192  ;;  %v235_v46 = vpop.xlane.xlu2 %234 }
 0x14f   :  { %v551_v51 = vmul.f32 0.015625, %v193_v50  ;;  %v565_v56 = vmul.f32 0.015625, %v235_v46  ;;  %v514_v53 = vpop.xlane.xlu0 %513 }
 0x150   :  { %v658_v54 = vmul.f32 0.015625, %v514_v53 }
 0x151   :  { %v913_v49 = vperm.slane %v551_v51, %v2301_v44  ;;  %v947_v59 = vperm.slane %v565_v56, %v2183_v6 }
 0x152   :  { %v1127_v58 = vperm.slane %v658_v54, %v1982_v34  ;;  %v693_v54 = vld [vmem:[%s2803_s1 + $0xd0] sm:$0xff] }
 0x153   :  { %v915_v0 = vsel %vm914_vm12, %v913_v49, %v2256_v57  ;;  %v948_v1 = vsel %vm906_vm10, %v947_v59, %v946_v15  ;;  %537 = vadd.xlane.f32.xlu1 %v536_v45  ;;  %v691_v49 = vld [vmem:[%s2803_s1 + $0xc0] sm:$0xff] }
 0x154   :  { %v1128_v52 = vsel %vm894_vm7, %v1127_v58, %v2253_v4  ;;  %534 = vadd.xlane.f32.xlu0 %v533_v60 }
 0x156   :  { %v331_v62 = vpop.xlane.xlu1 %330  ;;  %v382_v40 = vpop.xlane.xlu2 %381 }
 0x157   :  { %v597_v2 = vmul.f32 0.015625, %v331_v62  ;;  %v614_v42 = vmul.f32 0.015625, %v382_v40  ;;  %v289_v61 = vpop.xlane.xlu0 %288  ;;  %v729_v62 = vld [vmem:[%s2803_s1 + $0x1f0] sm:$0xff] }
 0x158   :  { %v583_v48 = vmul.f32 0.015625, %v289_v61  ;;  %1176 = vmatpush.msra.mxu1 %v729_v62  ;;  %v727_v61 = vld [vmem:[%s2803_s1 + $0x1e0] sm:$0xff]  ;;  %v2514_v62 = vadd.s32 4294967184, %v1669_v36 }
 0x159   :  { %v1009_v5 = vperm.slane %v597_v2, %v2183_v6  ;;  %v1042_v34 = vperm.slane %v614_v42, %v2234_v41  ;;  %v687_v2 = vld [vmem:[%s2803_s1 + $0xa0] sm:$0xff] }
 0x15a   :  { %v982_v8 = vperm.slane %v583_v48, %v2301_v44  ;;  %1177 = vmatpush.msra.mxu1 %v727_v61  ;;  %v2522_v61 = vadd.s32 4294967176, %v1669_v36 }
 0x15b   :  { %v1010_v57 = vsel %vm906_vm10, %v1009_v5, %v1008_v23  ;;  %v1043_v10 = vsel %vm910_vm11, %v1042_v34, %v1041_v31  ;;  %v697_v31 = vld [vmem:[%s2803_s1 + $0xf0] sm:$0xff] }
 0x15c   :  { %v983_v14 = vsel %vm914_vm12, %v982_v8, %v981_v20  ;;  %v2332_v20 = vadd.s32 4294967192, %v1669_v36  ;;  %1156 = vmatpush.msra.mxu0 %v697_v31  ;;  %v725_v34 = vld [vmem:[%s2803_s1 + $0x1d0] sm:$0xff]  ;;  %v683_v8 = vld [vmem:[%s2803_s1 + $0x80] sm:$0xff]  ;;  %v690_v31 = vld [vmem:[%s2803_s1 + $0xb8] sm:$0xff] }
 0x15d   :  { %1178 = vmatpush.msra.mxu1 %v725_v34  ;;  %v701_v34 = vld [vmem:[%s2803_s1 + $0x110] sm:$0xff]  ;;  %v724_v36 = vld [vmem:[%s2803_s1 + $0x1c8] sm:$0xff] }
 0x15e   :  { %v475_v4 = vpop.xlane.xlu1 %474  ;;  %v517_v13 = vpop.xlane.xlu2 %516  ;;  %1157 = vmatpush.msra.mxu0 %v695_v47 }
 0x15f   :  { %v645_v17 = vmul.f32 0.015625, %v475_v4  ;;  %v659_v3 = vmul.f32 0.015625, %v517_v13  ;;  %v424_v7 = vpop.xlane.xlu0 %423  ;;  %v681_v13 = vld [vmem:[%s2803_s1 + $0x70] sm:$0xff] }
 0x160   :  { %v628_v16 = vmul.f32 0.015625, %v424_v7  ;;  %1158 = vmatpush.msra.mxu0 %v693_v54  ;;  %v679_v7 = vld [vmem:[%s2803_s1 + $0x60] sm:$0xff]  ;;  %v705_v54 = vld [vmem:[%s2803_s1 + $0x130] sm:$0xff] }
 0x161   :  { %v1102_v18 = vperm.slane %v645_v17, %v2183_v6  ;;  %v1129_v19 = vperm.slane %v659_v3, %v2033_v9  ;;  %v721_v3 = vld [vmem:[%s2803_s1 + $0x1b0] sm:$0xff] }
 0x162   :  { %v1069_v12 = vperm.slane %v628_v16, %v2108_v11  ;;  %1159 = vmatpush.msra.mxu0 %v691_v49  ;;  %v688_v49 = vld [vmem:[%s2803_s1 + $0xa8] sm:$0xff] }
 0x163   :  { %v1103_v15 = vsel %vm906_vm10, %v1102_v18, %v1101_v43  ;;  %v1130_v23 = vsel %vm898_vm8, %v1129_v19, %v1128_v52  ;;  %v719_v18 = vld [vmem:[%s2803_s1 + $0x1a0] sm:$0xff]  ;;  %v677_v19 = vld [vmem:[%s2803_s1 + $0x50] sm:$0xff] }
 0x164   :  { %v1070_v21 = vsel %vm902_vm9, %v1069_v12, %v1068_v39 }
 0x166   :  { %v238_v27 = vpop.xlane.xlu1 %237  ;;  %v292_v28 = vpop.xlane.xlu2 %291 }
 0x167   :  { %v566_v30 = vmul.f32 0.015625, %v238_v27  ;;  %v584_v26 = vmul.f32 0.015625, %v292_v28  ;;  %v196_v32 = vpop.xlane.xlu0 %195  ;;  %v698_v27 = vld [vmem:[%s2803_s1 + $0xf8] sm:$0xff] }
 0x168   :  { %v552_v29 = vmul.f32 0.015625, %v196_v32  ;;  %1196 = vmatpush.msra.mxu2 %v698_v27  ;;  %v673_v32 = vld [vmem:[%s2803_s1 + $0x30] sm:$0xff] }
 0x169   :  { %v949_v9 = vperm.slane %v566_v30, %v2234_v41  ;;  %v984_v55 = vperm.slane %v584_v26, %v2332_v20  ;;  %v1272_v27 = vld [vmem:[%s2805_s3 + $0x50] sm:$0xff] }
 0x16a   :  { %v917_v63 = vperm.slane %v552_v29, %v2332_v20  ;;  %v713_v29 = vld [vmem:[%s2803_s1 + $0x170] sm:$0xff] }
 0x16b   :  { %v2338_v24 = vsel %vm910_vm11, %v949_v9, %v948_v1  ;;  %v2341_v25 = vsel %vm918_vm13, %v984_v55, %v983_v14  ;;  %v689_v1 = vld [vmem:[%s2803_s1 + $0xb0] sm:$0xff]  ;;  %v696_v9 = vld [vmem:[%s2803_s1 + $0xe8] sm:$0xff]  ;;  %v671_v55 = vld [vmem:[%s2803_s1 + $0x20] sm:$0xff] }
 0x16c   :  { %v2344_v38 = vsel %vm918_vm13, %v917_v63, %v915_v0  ;;  %1160 = vmatpush.msra.mxu0 %v689_v1  ;;  %1197 = vmatpush.msra.mxu2 %v696_v9  ;;  %v711_v63 = vld [vmem:[%s2803_s1 + $0x160] sm:$0xff]  ;;  %v686_v1 = vld [vmem:[%s2803_s1 + $0x98] sm:$0xff] }
 0x16e   :  { %v385_v37 = vpop.xlane.xlu1 %384  ;;  %v427_v22 = vpop.xlane.xlu2 %426  ;;  %1161 = vmatpush.msra.mxu0 %v687_v2 }
 0x16f   :  { %v615_v35 = vmul.f32 0.015625, %v385_v37  ;;  %v629_v39 = vmul.f32 0.015625, %v427_v22  ;;  %v334_v43 = vpop.xlane.xlu0 %333  ;;  %v669_v37 = vld [vmem:[%s2803_s1 + $0x10] sm:$0xff] }
 0x170   :  { %v598_v33 = vmul.f32 0.015625, %v334_v43  ;;  %v709_v22 = vld [vmem:[%s2803_s1 + $0x150] sm:$0xff]  ;;  %v707_v43 = vld [vmem:[%s2803_s1 + $0x140] sm:$0xff] }
 0x171   :  { %v1044_v50 = vperm.slane %v615_v35, %v2301_v44  ;;  %v1071_v46 = vperm.slane %v629_v39, %v2183_v6  ;;  %v692_v35 = vld [vmem:[%s2803_s1 + $0xc8] sm:$0xff]  ;;  %v667_v39 = vld [vmem:[%s2803_s1] sm:$0xff] }
 0x172   :  { %v1011_v51 = vperm.slane %v598_v33, %v2234_v41  ;;  %v1277_v33 = vld [vmem:[%s2805_s3 + $0x78] sm:$0xff] }
 0x173   :  { %v2356_v56 = vsel %vm914_vm12, %v1044_v50, %v1043_v10  ;;  %v2359_v53 = vsel %vm906_vm10, %v1071_v46, %v1070_v21  ;;  %v715_v21 = vld [vmem:[%s2803_s1 + $0x180] sm:$0xff] }
 0x174   :  { %v2365_v45 = vsel %vm910_vm11, %v1011_v51, %v1010_v57  ;;  %v723_v57 = vld [vmem:[%s2803_s1 + $0x1c0] sm:$0xff]  ;;  %v730_v51 = vld [vmem:[%s2803_s1 + $0x1f8] sm:$0xff] }
 0x175   :  { %1179 = vmatpush.msra.mxu1 %v723_v57  ;;  %1216 = vmatpush.msra.mxu3 %v730_v51  ;;  %v699_v57 = vld [vmem:[%s2803_s1 + $0x100] sm:$0xff]  ;;  %v1269_v51 = vld [vmem:[%s2805_s3 + $0x38] sm:$0xff] }
 0x176   :  { %v520_v59 = vpop.xlane.xlu1 %519  ;;  %v2370_v60 = vpop.xlane.xlu2 %198 }
 0x177   :  { %v660_v58 = vmul.f32 0.015625, %v520_v59  ;;  %v478_v0 = vpop.xlane.xlu0 %477  ;;  %1180 = vmatpush.msra.mxu1 %v721_v3  ;;  %v1276_v59 = vld [vmem:[%s2805_s3 + $0x70] sm:$0xff] }
 0x178   :  { %v646_v52 = vmul.f32 0.015625, %v478_v0  ;;  %v703_v0 = vld [vmem:[%s2803_s1 + $0x120] sm:$0xff] }
 0x179   :  { %v1131_v40 = vperm.slane %v660_v58, %v2108_v11  ;;  %v685_v11 = vld [vmem:[%s2803_s1 + $0x90] sm:$0xff]  ;;  %1181 = vmatpush.msra.mxu1 %v719_v18  ;;  %v728_v58 = vld [vmem:[%s2803_s1 + $0x1e8] sm:$0xff]  ;;  %v722_v18 = vld [vmem:[%s2803_s1 + $0x1b8] sm:$0xff] }
 0x17a   :  { %v1104_v42 = vperm.slane %v646_v52, %v2234_v41  ;;  %1162 = vmatpush.msra.mxu0 %v685_v11  ;;  %1217 = vmatpush.msra.mxu3 %v728_v58  ;;  %v1275_v52 = vld [vmem:[%s2805_s3 + $0x68] sm:$0xff] }
 0x17b   :  { %v2387_v48 = vsel %vm902_vm9, %v1131_v40, %v1130_v23  ;;  %v675_v23 = vld [vmem:[%s2803_s1 + $0x40] sm:$0xff]  ;;  %v553_v40 = vmul.f32 0.015625, %v2370_v60  ;;  %v684_v60 = vld [vmem:[%s2803_s1 + $0x88] sm:$0xff] }
 0x17c   :  { %v2393_v5 = vsel %vm910_vm11, %v1104_v42, %v1103_v15  ;;  %1163 = vmatpush.msra.mxu0 %v683_v8  ;;  %v717_v15 = vld [vmem:[%s2803_s1 + $0x190] sm:$0xff]  ;;  %v726_v42 = vld [vmem:[%s2803_s1 + $0x1d8] sm:$0xff]  ;;  %v1274_v8 = vld [vmem:[%s2805_s3 + $0x60] sm:$0xff] }
 0x17d   :  { %1182 = vmatpush.msra.mxu1 %v717_v15  ;;  %1218 = vmatpush.msra.mxu3 %v726_v42  ;;  %v921_v3 = vperm.slane %v553_v40, %v2514_v62  ;;  %v1268_v40 = vld [vmem:[%s2805_s3 + $0x30] sm:$0xff]  ;;  %v712_v42 = vld [vmem:[%s2803_s1 + $0x168] sm:$0xff] }
 0x17e   :  { %v2404_v10 = vpop.xlane.xlu1 %294  ;;  %v2406_v14 = vpop.xlane.xlu2 %336  ;;  %1164 = vmatpush.msra.mxu0 %v681_v13 }
 0x17f   :  { %v241_v4 = vpop.xlane.xlu0 %240  ;;  %1183 = vmatpush.msra.mxu1 %v715_v21  ;;  %v585_v2 = vmul.f32 0.015625, %v2404_v10  ;;  %v682_v10 = vld [vmem:[%s2803_s1 + $0x78] sm:$0xff]  ;;  %1219 = vmatpush.msra.mxu3 %v724_v36  ;;  %v680_v21 = vld [vmem:[%s2803_s1 + $0x68] sm:$0xff] }
 0x180   :  { %v567_v17 = vmul.f32 0.015625, %v241_v4  ;;  %1165 = vmatpush.msra.mxu0 %v679_v7  ;;  %v1287_v36 = vld [vmem:[%s2805_s3 + $0xc8] sm:$0xff] }
 0x181   :  { %1184 = vmatpush.msra.mxu1 %v713_v29  ;;  %v986_v7 = vperm.slane %v585_v2, %v2514_v62  ;;  %1220 = vmatpush.msra.mxu3 %v722_v18  ;;  %v1292_v29 = vld [vmem:[%s2805_s3 + $0xf0] sm:$0xff] }
 0x182   :  { %v951_v16 = vperm.slane %v567_v17, %v2301_v44  ;;  %1166 = vmatpush.msra.mxu0 %v677_v19  ;;  %v1273_v17 = vld [vmem:[%s2805_s3 + $0x58] sm:$0xff] }
 0x183   :  { %1185 = vmatpush.msra.mxu1 %v711_v63  ;;  %v1293_v19 = vld [vmem:[%s2805_s3 + $0xf8] sm:$0xff]  ;;  %v1271_v63 = vld [vmem:[%s2805_s3 + $0x48] sm:$0xff] }
 0x184   :  { %v2426_v12 = vsel %vm914_vm12, %v951_v16, %v2338_v24  ;;  %1167 = vmatpush.msra.mxu0 %v675_v23  ;;  %v694_v24 = vld [vmem:[%s2803_s1 + $0xd8] sm:$0xff] }
 0x185   :  { %1198 = vmatpush.msra.mxu2 %v694_v24  ;;  %1186 = vmatpush.msra.mxu1 %v709_v22  ;;  %v923_v24 = vsel %vm922_vm14, %v921_v3, %v2344_v38  ;;  %v718_v22 = vld [vmem:[%s2803_s1 + $0x198] sm:$0xff]  ;;  %v1270_v38 = vld [vmem:[%s2805_s3 + $0x40] sm:$0xff] }
 0x186   :  { %v2440_v28 = vpop.xlane.xlu1 %429  ;;  %v2442_v30 = vpop.xlane.xlu2 %480  ;;  %1168 = vmatpush.msra.mxu0 %v673_v32  ;;  %v720_v32 = vld [vmem:[%s2803_s1 + $0x1a8] sm:$0xff]  ;;  %v1286_v3 = vld [vmem:[%s2805_s3 + $0xc0] sm:$0xff] }
 0x187   :  { %v2444_v26 = vpop.xlane.xlu0 %387  ;;  %1199 = vmatpush.msra.mxu2 %v692_v35  ;;  %1187 = vmatpush.msra.mxu1 %v707_v43  ;;  %v1291_v35 = vld [vmem:[%s2805_s3 + $0xe8] sm:$0xff] }
 0x188   :  { %1169 = vmatpush.msra.mxu0 %v671_v55  ;;  %1221 = vmatpush.msra.mxu3 %v720_v32  ;;  %v678_v55 = vld [vmem:[%s2803_s1 + $0x58] sm:$0xff]  ;;  %v616_v2 = vmul.f32 0.015625, %v2444_v26  ;;  %v1267_v26 = vld [vmem:[%s2805_s3 + $0x28] sm:$0xff]  ;;  %v1264_v32 = vld [vmem:[%s2805_s3 + $0x10] sm:$0xff] }
 0x189   :  { %1200 = vmatpush.msra.mxu2 %v690_v31  ;;  %1188 = vmatpush.msra.mxu1 %v705_v54  ;;  %v716_v31 = vld [vmem:[%s2803_s1 + $0x188] sm:$0xff] }
 0x18a   :  { %1170 = vmatpush.msra.mxu0 %v669_v37  ;;  %v987_v37 = vsel %vm922_vm14, %v986_v7, %v2341_v25  ;;  %1222 = vmatpush.msra.mxu3 %v718_v22  ;;  %v676_v25 = vld [vmem:[%s2803_s1 + $0x48] sm:$0xff] }
 0x18b   :  { %1201 = vmatpush.msra.mxu2 %v688_v49  ;;  %1189 = vmatpush.msra.mxu1 %v703_v0  ;;  %v714_v0 = vld [vmem:[%s2803_s1 + $0x178] sm:$0xff]  ;;  %v1283_v22 = vld [vmem:[%s2805_s3 + $0xa8] sm:$0xff] }
 0x18c   :  { %1171 = vmatpush.msra.mxu0 %v667_v39  ;;  %1223 = vmatpush.msra.mxu3 %v716_v31 }
 0x18d   :  { %1202 = vmatpush.msra.mxu2 %v686_v1  ;;  %1190 = vmatpush.msra.mxu1 %v701_v34  ;;  %v1289_v1 = vld [vmem:[%s2805_s3 + $0xd8] sm:$0xff] }
 0x18e   :  { %v202_v50 = vpop.xlane.xlu1 %201  ;;  %v2485_v46 = vpop.xlane.xlu2 %243  ;;  %1298 = vmatpush.msrb.mxu0 %v1277_v33  ;;  %v1290_v33 = vld [vmem:[%s2805_s3 + $0xe0] sm:$0xff]  ;;  %1224 = vmatpush.msra.mxu3 %v714_v0  ;;  %v1280_v0 = vld [vmem:[%s2805_s3 + $0x90] sm:$0xff] }
 0x18f   :  { %v2487_v47 = vpop.xlane.xlu0 %522  ;;  %v554_v11 = vmul.f32 0.015625, %v202_v50  ;;  %1203 = vmatpush.msra.mxu2 %v684_v60  ;;  %1191 = vmatpush.msra.mxu1 %v699_v57  ;;  %v674_v50 = vld [vmem:[%s2803_s1 + $0x38] sm:$0xff]  ;;  %v668_v57 = vld [vmem:[%s2803_s1 + $0x8] sm:$0xff] }
 0x190   :  { %1299 = vmatpush.msrb.mxu0 %v1276_v59  ;;  %1225 = vmatpush.msra.mxu3 %v712_v42  ;;  %v670_v60 = vld [vmem:[%s2803_s1 + $0x18] sm:$0xff] }
 0x191   :  { %1204 = vmatpush.msra.mxu2 %v682_v10  ;;  %v925_v15 = vperm.slane %v554_v11, %v2522_v61  ;;  %1318 = vmatpush.msrb.mxu1 %v1293_v19  ;;  %v1288_v11 = vld [vmem:[%s2805_s3 + $0xd0] sm:$0xff]  ;;  %v1266_v10 = vld [vmem:[%s2805_s3 + $0x20] sm:$0xff]  ;;  %v1265_v19 = vld [vmem:[%s2805_s3 + $0x18] sm:$0xff] }
 0x192   :  { %1300 = vmatpush.msrb.mxu0 %v1275_v52  ;;  %v672_v52 = vld [vmem:[%s2803_s1 + $0x28] sm:$0xff] }
 0x193   :  { %1205 = vmatpush.msra.mxu2 %v680_v21  ;;  %1319 = vmatpush.msrb.mxu1 %v1292_v29  ;;  %v927_v39 = vsel %vm926_vm15, %v925_v15, %v923_v24  ;;  %v706_v21 = vld [vmem:[%s2803_s1 + $0x138] sm:$0xff] }
 0x194   :  { %1301 = vmatpush.msrb.mxu0 %v1274_v8  ;;  %v710_v8 = vld [vmem:[%s2803_s1 + $0x158] sm:$0xff] }
 0x195   :  { %1206 = vmatpush.msra.mxu2 %v678_v55  ;;  %1320 = vmatpush.msrb.mxu1 %v1291_v35  ;;  %v704_v55 = vld [vmem:[%s2803_s1 + $0x128] sm:$0xff] }
 0x196   :  { %v2542_v4 = vpop.xlane.xlu1 %339  ;;  %v2544_v13 = vpop.xlane.xlu2 %390  ;;  %1302 = vmatpush.msrb.mxu0 %v1273_v17  ;;  %1226 = vmatpush.msra.mxu3 %v710_v8  ;;  %v708_v17 = vld [vmem:[%s2803_s1 + $0x148] sm:$0xff]  ;;  %v630_v8 = vmul.f32 0.015625, %v2440_v28 }
 0x197   :  { %v298_v16 = vpop.xlane.xlu0 %297  ;;  %1207 = vmatpush.msra.mxu2 %v676_v25  ;;  %1321 = vmatpush.msrb.mxu1 %v1290_v33  ;;  %v617_v34 = vmul.f32 0.015625, %v2544_v13  ;;  %v1046_v13 = vperm.slane %v616_v2, %v2332_v20  ;;  %v1279_v2 = vld [vmem:[%s2805_s3 + $0x88] sm:$0xff] }
 0x198   :  { %v586_v23 = vmul.f32 0.015625, %v298_v16  ;;  %1303 = vmatpush.msrb.mxu0 %v1272_v27  ;;  %1227 = vmatpush.msra.mxu3 %v708_v17  ;;  %v1285_v27 = vld [vmem:[%s2805_s3 + $0xb8] sm:$0xff]  ;;  %v647_v17 = vmul.f32 0.015625, %v2442_v30  ;;  %v1073_v30 = vperm.slane %v630_v8, %v2234_v41 }
 0x199   :  { %1208 = vmatpush.msra.mxu2 %v674_v50  ;;  %1322 = vmatpush.msrb.mxu1 %v1289_v1  ;;  %v1048_v7 = vperm.slane %v617_v34, %v2514_v62  ;;  %v1047_v29 = vsel %vm918_vm13, %v1046_v13, %v2356_v56  ;;  %v1263_v56 = vld [vmem:[%s2805_s3 + $0x8] sm:$0xff]  ;;  %v600_v1 = vmul.f32 0.015625, %v2542_v4 }
 0x19a   :  { %v988_v9 = vperm.slane %v586_v23, %v2522_v61  ;;  %1304 = vmatpush.msrb.mxu0 %v1271_v63  ;;  %1228 = vmatpush.msra.mxu3 %v706_v21  ;;  %v1284_v63 = vld [vmem:[%s2805_s3 + $0xb0] sm:$0xff] }
 0x19b   :  { %1209 = vmatpush.msra.mxu2 %v672_v52  ;;  %1323 = vmatpush.msrb.mxu1 %v1288_v11  ;;  %v1049_v24 = vsel %vm922_vm14, %v1048_v7, %v1047_v29  ;;  %v568_v52 = vmul.f32 0.015625, %v2485_v46  ;;  %v1015_v34 = vperm.slane %v600_v1, %v2332_v20 }
 0x19c   :  { %v989_v43 = vsel %vm926_vm15, %v988_v9, %v987_v37  ;;  %1305 = vmatpush.msrb.mxu0 %v1270_v38  ;;  %1229 = vmatpush.msra.mxu3 %v704_v55  ;;  %v702_v37 = vld [vmem:[%s2803_s1 + $0x118] sm:$0xff]  ;;  %v1282_v38 = vld [vmem:[%s2805_s3 + $0xa0] sm:$0xff] }
 0x19d   :  { %v2608_v54 = vsel %vm1145_vm0, %v989_v43, %v927_v39  ;;  %1210 = vmatpush.msra.mxu2 %v670_v60  ;;  %1324 = vmatpush.msrb.mxu1 %v1287_v36  ;;  %v1262_v39 = vld [vmem:[%s2805_s3] sm:$0xff]  ;;  %v700_v43 = vld [vmem:[%s2803_s1 + $0x108] sm:$0xff]  ;;  %v953_v4 = vperm.slane %v568_v52, %v2332_v20 }
 0x19e   :  { %v2610_v49 = vpop.xlane.xlu1 %483  ;;  %v2612_v59 = vpop.xlane.xlu2 %525  ;;  %1306 = vmatpush.msrb.mxu0 %v1269_v51  ;;  %1230 = vmatpush.msra.mxu3 %v702_v37  ;;  %v1281_v51 = vld [vmem:[%s2805_s3 + $0x98] sm:$0xff] }
 0x19f   :  { %v2614_v58 = vpop.xlane.xlu0 %432  ;;  %1211 = vmatpush.msra.mxu2 %v668_v57  ;;  %1325 = vmatpush.msrb.mxu1 %v1286_v3 }
 0x1a0   :  { %1307 = vmatpush.msrb.mxu0 %v1268_v40  ;;  %1231 = vmatpush.msra.mxu3 %v700_v43  ;;  %v631_v3 = vmul.f32 0.015625, %v2614_v58 }
 0x1a1   :  { %1326 = vmatpush.msrb.mxu1 %v1285_v27 }
 0x1a2   :  { %1308 = vmatpush.msrb.mxu0 %v1267_v26  ;;  %v1075_v29 = vperm.slane %v631_v3, %v2301_v44 }
 0x1a3   :  { %1327 = vmatpush.msrb.mxu1 %v1284_v63 }
 0x1a4   :  { %1309 = vmatpush.msrb.mxu0 %v1266_v10 }
 0x1a5   :  { %1328 = vmatpush.msrb.mxu1 %v1283_v22  ;;  %v1074_v22 = vsel %vm910_vm11, %v1073_v30, %v2359_v53 }
 0x1a6   :  { %v343_v16 = vpop.xlane.xlu1 %342  ;;  %v394_v18 = vpop.xlane.xlu2 %393  ;;  %1310 = vmatpush.msrb.mxu0 %v1265_v19 }
 0x1a7   :  { %v618_v15 = vmul.f32 0.015625, %v394_v18  ;;  %v247_v23 = vpop.xlane.xlu0 %246  ;;  %1329 = vmatpush.msrb.mxu1 %v1282_v38  ;;  %v601_v40 = vmul.f32 0.015625, %v343_v16  ;;  %v648_v18 = vmul.f32 0.015625, %v2610_v49  ;;  %v1106_v49 = vperm.slane %v647_v17, %v2301_v44 }
 0x1a8   :  { %1311 = vmatpush.msrb.mxu0 %v1264_v32  ;;  %v569_v42 = vmul.f32 0.015625, %v247_v23 }
 0x1a9   :  { %v1050_v9 = vperm.slane %v618_v15, %v2522_v61  ;;  %1330 = vmatpush.msrb.mxu1 %v1281_v51  ;;  %v1017_v46 = vperm.slane %v601_v40, %v2514_v62  ;;  %v954_v15 = vsel %vm918_vm13, %v953_v4, %v2426_v12  ;;  %v1108_v12 = vperm.slane %v648_v18, %v2332_v20 }
 0x1aa   :  { %1312 = vmatpush.msrb.mxu0 %v1263_v56  ;;  %v955_v36 = vperm.slane %v569_v42, %v2514_v62  ;;  %v1107_v38 = vsel %vm914_vm12, %v1106_v49, %v2393_v5 }
 0x1ab   :  { %v1051_v35 = vsel %vm926_vm15, %v1050_v9, %v1049_v24  ;;  %1331 = vmatpush.msrb.mxu1 %v1280_v0  ;;  %v662_v0 = vmul.f32 0.015625, %v2612_v59 }
 0x1ac   :  { %v2702_v25 = vsel %vm1147_vm1, %v1051_v35, %v2608_v54  ;;  %1313 = vmatpush.msrb.mxu0 %v1262_v39  ;;  %v599_v54 = vmul.f32 0.015625, %v2406_v14  ;;  %v1278_v14 = vld [vmem:[%s2805_s3 + $0x80] sm:$0xff]  ;;  %v956_v58 = vsel %vm922_vm14, %v955_v36, %v954_v15 }
 0x1ad   :  { %1332 = vmatpush.msrb.mxu1 %v1279_v2 }
 0x1ae   :  { %v487_v31 = vpop.xlane.xlu1 %486  ;;  %v2707_v33 = vpop.xlane.xlu2 %528  ;;  %v1013_v11 = vperm.slane %v599_v54, %v2301_v44  ;;  %v1109_v54 = vsel %vm918_vm13, %v1108_v12, %v1107_v38  ;;  %v1239_v12 = vld [vmem:[%s2807_s5] sm:$0xf] }
 0x1af   :  { %v436_v50 = vpop.xlane.xlu0 %435  ;;  %1333 = vmatpush.msrb.mxu1 %v1278_v14  ;;  %v649_v27 = vmul.f32 0.015625, %v487_v31  ;;  %v661_v31 = vmul.f32 0.015625, %v2487_v47  ;;  %v663_v52 = vmul.f32 0.015625, %v2707_v33 }
 0x1b0   :  { %v1014_v13 = vsel %vm914_vm12, %v1013_v11, %v2365_v45  ;;  %v632_v19 = vmul.f32 0.015625, %v436_v50  ;;  %v1076_v50 = vsel %vm914_vm12, %v1075_v29, %v1074_v22 }
 0x1b1   :  { %v1016_v16 = vsel %vm918_vm13, %v1015_v34, %v1014_v13  ;;  %v1110_v35 = vperm.slane %v649_v27, %v2514_v62  ;;  %v1133_v11 = vperm.slane %v661_v31, %v2183_v6  ;;  %v1135_v34 = vperm.slane %v662_v0, %v2234_v41 }
 0x1b2   :  { %v1018_v23 = vsel %vm922_vm14, %v1017_v46, %v1016_v16  ;;  %v1077_v55 = vperm.slane %v632_v19, %v2332_v20  ;;  %v1137_v4 = vperm.slane %v663_v52, %v2301_v44  ;;  %v1403_v16 = vld [vmem:[%s2806_s4] ss:$0 sm:$0xff] }
 0x1b3   :  { %v1111_v47 = vsel %vm922_vm14, %v1110_v35, %v1109_v54  ;;  %v1134_v6 = vsel %vm906_vm10, %v1133_v11, %v2387_v48 }
 0x1b4   :  { %v1078_v1 = vsel %vm918_vm13, %v1077_v55, %v1076_v50 }
 0x1b6   :  { %v346_v60 = vpop.xlane.xlu1 %345  ;;  %v439_v26 = vpop.xlane.xlu2 %438 }
 0x1b7   :  { %v602_v57 = vmul.f32 0.015625, %v346_v60  ;;  %v250_v10 = vpop.xlane.xlu0 %249  ;;  %v633_v21 = vmul.f32 0.015625, %v439_v26 }
 0x1b8   :  { %v570_v7 = vmul.f32 0.015625, %v250_v10 }
 0x1b9   :  { %v1019_v28 = vperm.slane %v602_v57, %v2522_v61  ;;  %v1079_v24 = vperm.slane %v633_v21, %v2514_v62  ;;  %v1136_v57 = vsel %vm910_vm11, %v1135_v34, %v1134_v6 }
 0x1ba   :  { %v957_v45 = vperm.slane %v570_v7, %v2522_v61  ;;  %v1138_v10 = vsel %vm914_vm12, %v1137_v4, %v1136_v57 }
 0x1bb   :  { %v1020_v32 = vsel %vm926_vm15, %v1019_v28, %v1018_v23  ;;  %v1080_v40 = vsel %vm922_vm14, %v1079_v24, %v1078_v1 }
 0x1bc   :  { %v958_v9 = vsel %vm926_vm15, %v957_v45, %v956_v58 }
 0x1bd   :  { %v1151_v63 = vsel %vm1145_vm0, %v1020_v32, %v958_v9 }
 0x1be   :  { %v532_v56 = vpop.xlane.xlu1 %531  ;;  %v442_v37 = vpop.xlane.xlu2 %441 }
 0x1bf   :  { %v634_v39 = vmul.f32 0.015625, %v442_v37  ;;  %v490_v43 = vpop.xlane.xlu0 %489  ;;  %v664_v5 = vmul.f32 0.015625, %v532_v56 }
 0x1c0   :  { %v650_v51 = vmul.f32 0.015625, %v490_v43 }
 0x1c1   :  { %v1081_v53 = vperm.slane %v634_v39, %v2522_v61  ;;  %v1139_v60 = vperm.slane %v664_v5, %v2332_v20 }
 0x1c2   :  { %v1112_v2 = vperm.slane %v650_v51, %v2522_v61 }
 0x1c3   :  { %v1082_v42 = vsel %vm926_vm15, %v1081_v53, %v1080_v40  ;;  %v1140_v44 = vsel %vm918_vm13, %v1139_v60, %v1138_v10 }
 0x1c4   :  { %v1113_v59 = vsel %vm926_vm15, %v1112_v2, %v1111_v47  ;;  %v1152_v14 = vsel %vm1147_vm1, %v1082_v42, %v1151_v63 }
 0x1c5   :  { %v1150_v33 = vsel %vm1149_vm2, %v1113_v59, %v2702_v25 }
 0x1c6   :  { %1172 = vmatmul.f32.vlgmr.msra.gmra.mxu0 %v1150_v33  ;;  %1212 = vmatmul.f32.vlgmr.msra.gmra.mxu2 %v1150_v33  ;;  %v538_v46 = vpop.xlane.xlu1 %537 }
 0x1c7   :  { %v535_v26 = vpop.xlane.xlu0 %534  ;;  %v666_v8 = vmul.f32 0.015625, %v538_v46 }
 0x1c8   :  { %v665_v36 = vmul.f32 0.015625, %v535_v26 }
 0x1c9   :  { %v1143_v41 = vperm.slane %v666_v8, %v2522_v61  ;;  %v731_v61 = vld [vmem:[%s2804_s2] sm:$0x3] }
 0x1ca   :  { %v1141_v25 = vperm.slane %v665_v36, %v2514_v62  ;;  %v734_v7 = vperm.slane %v731_v61, 1  ;;  %v733_v21 = vperm.slane %v731_v61, 0 }
 0x1cc   :  { %v1142_v13 = vsel %vm922_vm14, %v1141_v25, %v1140_v44 }
 0x1cd   :  { %v1144_v20 = vsel %vm926_vm15, %v1143_v41, %v1142_v13 }
 0x1ce   :  { %1314 = vmatmul.f32.vlgmr.msrb.gmra.mxu0 %v1150_v33  ;;  %v1153_v17 = vsel %vm1149_vm2, %v1144_v20, %v1152_v14 }
 0x1cf   :  { %1192 = vmatmul.f32.vlgmr.msra.gmra.mxu1 %v1153_v17  ;;  %1232 = vmatmul.f32.vlgmr.msra.gmra.mxu3 %v1153_v17 }
 0x1d7   :  { %1334 = vmatmul.f32.vlgmr.msrb.gmra.mxu1 %v1153_v17 }
 0x243   :  { %v1173_v48 = vpop.f32.mrf.mxu0 }
 0x244   :  { %v1174_v49 = vadd.f32 %v1173_v48, %v733_v21 }
 0x249   :  { %v1213_v62 = vpop.f32.mrf.mxu2 }
 0x24a   :  { %v1214_v19 = vadd.f32 %v1213_v62, %v734_v7 }
 0x24b   :  { %v1315_v18 = vpop.f32.mrf.mxu0 }
 0x24c   :  { %v1193_v3 = vpop.f32.mrf.mxu1  ;;  %v1316_v15 = vadd.f32 %v1403_v16, %v1315_v18 }
 0x24d   :  { %v1194_v29 = vadd.f32 %v1193_v3, %v1174_v49 }
 0x24f   :  { %v1243_v55 = vmul.f32 %v1194_v29, %v1194_v29 }
 0x252   :  { %v1233_v28 = vpop.f32.mrf.mxu3 }
 0x253   :  { %v1234_v23 = vadd.f32 %v1233_v28, %v1214_v19 }
 0x254   :  { %v1335_v45 = vpop.f32.mrf.mxu1 }
 0x255   :  { %v1236_v30 = vmul.f32 0.5, %v1234_v23  ;;  %v1336_v58 = vadd.f32 %v1335_v45, %v1316_v15  ;;  %v1242_v9 = vadd.f32 1.0, %v1234_v23 }
 0x257   :  { %v1237_v27 = vmul.f32 1.442695, %v1236_v30  ;;  %v1339_v32 = vsel %vm1338_vm3, %v1336_v58, -inf  ;;  %v1244_v56 = vsub.f32 %v1242_v9, %v1243_v55 }
 0x258   :  { %1340 = vmax.xlane.f32.xlu2 %v1339_v32 }
 0x259   :  { %1404 = vpow2.f32 %v1237_v27 }
 0x25f   :  { %v1405_v63 = vpop.eup %1404 }
 0x260   :  { %v1240_v24 = vmul.f32 %v1405_v63, %v1239_v12  ;;  %v1245_v37 = vmul.f32 %v1405_v63, %v1405_v63 }
 0x262   :  { %v1241_v22 = vadd.f32 %v1240_v24, %v1194_v29  ;;  %v1246_v35 = vsub.f32 %v1244_v56, %v1245_v37 }
 0x264   :  { %1398 = vmatpush.msk.msrb.mxu2 %vm1247_vm4, %v1241_v22  ;;  %v1248_v39 = vsel %vm1247_vm4, %v1246_v35, 0.0 }
 0x265   :  { %1249 = vadd.xlane.f32.xlu1 %v1248_v39 }
 0x2cb   :  { %v1341_v43 = vpop.xlane.xlu2 %1340 }
 0x2cc   :  { %v1342_v38 = vsub.f32 %v1336_v58, %v1341_v43 }
 0x2ce   :  { %v1343_v31 = vmul.f32 1.442695, %v1342_v38 }
 0x2d0   :  { %1406 = vpow2.f32 %v1343_v31 }
 0x2d6   :  { %v1407_v50 = vpop.eup %1406 }
 0x2d7   :  { %v1345_v51 = vsel %vm1338_vm3, %v1407_v50, 0.0 }
 0x2d8   :  { %1346 = vadd.xlane.f32.xlu0 %v1345_v51  ;;  %v1250_v54 = vpop.xlane.xlu1 %1249 }
 0x2d9   :  { %v1251_v0 = vrot.slane %v1250_v54, 4 }
 0x2db   :  { %v1252_v1 = vadd.f32 %v1251_v0, %v1250_v54 }
 0x2dd   :  { %v1253_v53 = vrot.slane %v1252_v1, 2 }
 0x2df   :  { %v1254_v52 = vadd.f32 %v1253_v53, %v1252_v1 }
 0x2e1   :  { %v1255_v40 = vrot.slane %v1254_v52, 1 }
 0x2e3   :  { %v1256_v2 = vadd.f32 %v1255_v40, %v1254_v52 }
 0x2e5   :  { %1400 = vpush %v1256_v2 }
 0x316   :  { %s1401_s5 = spop %1400 }
 0x317   :  { %v1258_v5 = vstv %s1401_s5 }
 0x318   :  { %v1259_v47 = vmul.f32 -0.5, %v1258_v5 }
 0x31a   :  { %1261 = vst.msk [vmem:[#allocation2] sm:$0x1] %vm1260_vm5, %v1259_v47 }
 0x31b   :  { %1390 = dma.vmem_to_hbm [thread:$0]  %s1386_s29, 16, %s1388_s9, [#allocation3]  }
 0x34b   :  { %v1347_v42 = vpop.xlane.xlu0 %1346 }
 0x34c   :  { %1408 = vrcp.f32 %v1347_v42 }
 0x352   :  { %v1409_v11 = vpop.eup %1408 }
 0x353   :  { %v1349_v59 = vmul.f32 %v1409_v11, %v1407_v50 }
 0x355   :  { %1399 = vmatmul.msk.f32.vlgmr.msrb.gmra.mxu2 %vm1350_vm6, %v1349_v59 }
 0x3d8   :  { %v1374_v14 = vpop.f32.mrf.mxu2 }
 0x3d9   :  { %1377 = vst [vmem:[%s2808_s6] sm:$0xf] %v1374_v14 }
 0x3da   :  { %1434 = dma.done.wait [#allocation3], 16  }
 0x3db   :  { %1435 = vsyncadd [#allocation3], 4294967280 }
 0x3dc   :  { %1397 = vsyncpa [#allocation3], 1 }

</bundles_post_ra>
